<compile_context>
chip_gen: v7x
topology: tpu7x:2x2x1
jax: 0.10.0
libtpu: 0.0.40
codegen_flags: <defaults>
</compile_context>

<pallas_src>
import functools

import jax
import jax.numpy as jnp
from jax.experimental import pallas as pl
from jax.experimental.pallas import tpu as pltpu

LN_EPS = 1e-5  # nn.LayerNorm default


def _layernorm(x, g, b):
    mu = jnp.mean(x, axis=-1, keepdims=True)
    var = jnp.mean((x - mu) ** 2, axis=-1, keepdims=True)
    return (x - mu) * jax.lax.rsqrt(var + LN_EPS) * g + b


# ---------------------------------------------------------------------------
# Kernel 1: LN1 + fused K|V projection, head-major bf16 outputs (B, H, T, dh)
# ---------------------------------------------------------------------------
def ln_kv_kernel(x_ref, g_ref, b_ref, wkv_ref, bkv_ref, k_ref, v_ref, *, n_head):
    x = x_ref[0]                                     # (TQ1, E) f32
    TQ1, E = x.shape
    dh = E // n_head
    h = _layernorm(x, g_ref[...], b_ref[...]).astype(jnp.bfloat16)
    # One wide MXU pass (N = 2E) instead of two N = E dots.
    kv = jnp.dot(h, wkv_ref[...], preferred_element_type=jnp.float32) + bkv_ref[...]
    # Cast to bf16 BEFORE the head relayout (half the XLU/VMEM traffic); this
    # relayout happens once per row tile here instead of once per KV step in
    # the attention kernel.
    k_hm = kv[:, :E].astype(jnp.bfloat16).reshape(TQ1, n_head, dh).transpose(1, 0, 2)
    v_hm = kv[:, E:].astype(jnp.bfloat16).reshape(TQ1, n_head, dh).transpose(1, 0, 2)
    k_ref[0] = k_hm
    v_ref[0] = v_hm


# ---------------------------------------------------------------------------
# Kernel 2: flash attention over a pipelined KV grid axis + Wo + residual
#           + LN2 + hidden-chunked FFN + residual
# ---------------------------------------------------------------------------
def attn_ffn_kernel(x_ref, k_ref, v_ref,
                    ln1_g_ref, ln1_b_ref, wq_ref, bq_ref,
                    wo_ref, bo_ref, ln2_g_ref, ln2_b_ref,
                    w1_ref, b1_ref, w2_ref, b2_ref,
                    o_ref,
                    q_scr, m_scr, l_scr, acc_scr,
                    *, n_head, hidden_tile):
    TQ, E = x_ref.shape[1], x_ref.shape[2]
    dh = E // n_head
    kv_idx = pl.program_id(2)

    # ---- init (once per (b, i) output tile): Q from resident x, zero stats --
    @pl.when(kv_idx == 0)
    def _():
        xt = x_ref[0]                                # (TQ, E) f32
        h1 = _layernorm(xt, ln1_g_ref[...], ln1_b_ref[...]).astype(jnp.bfloat16)
        # 1/sqrt(dh) is pre-folded into wq/bq on the host.
        q = jnp.dot(h1, wq_ref[...], preferred_element_type=jnp.float32) + bq_ref[...]
        q_scr[...] = (q.astype(jnp.bfloat16)
                      .reshape(TQ, n_head, dh).transpose(1, 0, 2))   # (H, TQ, dh)
        m_scr[...] = jnp.full(m_scr.shape, -jnp.inf, jnp.float32)
        l_scr[...] = jnp.zeros(l_scr.shape, jnp.float32)
        acc_scr[...] = jnp.zeros(acc_scr.shape, jnp.float32)

    # ---- online-softmax step over this KV tile (no relayout, no casts) ------
    kb = k_ref[0]                                    # (H, TK, dh) bf16, head-major
    vb = v_ref[0]                                    # (H, TK, dh) bf16
    s = jnp.einsum('hqd,hkd->hqk', q_scr[...], kb,
                   preferred_element_type=jnp.float32)               # (H, TQ, TK)
    m_prev = m_scr[...]
    m_new = jnp.maximum(m_prev, jnp.max(s, axis=-1, keepdims=True))
    alpha = jnp.exp(m_prev - m_new)
    # TODO(synk): on v6e/v7x (bf16 EUP) p could be computed in bf16 if the EUP
    # slot binds; kept f32 for v5e safety / parity.
    p = jnp.exp(s - m_new)
    l_scr[...] = alpha * l_scr[...] + jnp.sum(p, axis=-1, keepdims=True)
    acc_scr[...] = alpha * acc_scr[...] + jnp.einsum(
        'hqk,hkd->hqd', p.astype(jnp.bfloat16), vb,
        preferred_element_type=jnp.float32)
    m_scr[...] = m_new

    # ---- finalize: Wo + residual 1, LN2 + chunked FFN + residual 2 ----------
    @pl.when(kv_idx == pl.num_programs(2) - 1)
    def _():
        attn = (acc_scr[...] * pl.reciprocal(l_scr[...], approx=True)
                ).astype(jnp.bfloat16)               # (H, TQ, dh)
        attn = attn.transpose(1, 0, 2).reshape(TQ, E)
        proj = jnp.dot(attn, wo_ref[...],
                       preferred_element_type=jnp.float32) + bo_ref[...]
        x1 = x_ref[0] + proj                         # dropout = 0 (eval mode)

        h2 = _layernorm(x1, ln2_g_ref[...], ln2_b_ref[...]).astype(jnp.bfloat16)
        n_hc = w1_ref.shape[1] // hidden_tile

        def ffn_step(c, out_acc):
            c0 = pl.multiple_of(c * hidden_tile, hidden_tile)
            hid = jnp.dot(h2, w1_ref[:, pl.ds(c0, hidden_tile)],
                          preferred_element_type=jnp.float32)
            hid = jnp.maximum(hid + b1_ref[:, pl.ds(c0, hidden_tile)], 0.0)
            return out_acc + jnp.dot(hid.astype(jnp.bfloat16),
                                     w2_ref[pl.ds(c0, hidden_tile), :],
                                     preferred_element_type=jnp.float32)

        # Fully unrolled: lets the LLO scheduler interleave w1/ReLU/w2 of
        # adjacent chunks across MXU/VPU slots.
        ffn = jax.lax.fori_loop(0, n_hc, ffn_step,
                                jnp.zeros((TQ, E), jnp.float32), unroll=True)
        o_ref[0] = (x1 + ffn + b2_ref[...]).astype(o_ref.dtype)   # dropout = 0


# ---------------------------------------------------------------------------
# Host-side wrapper
# ---------------------------------------------------------------------------
def _pick_tile(n, target, quantum):
    """Largest divisor of n that is <= target and a multiple of quantum."""
    if n <= target:
        return n
    start = target - (target % quantum)
    for cand in range(start, 0, -quantum):
        if n % cand == 0:
            return cand
    return n


def _vmem_cap_bytes():
    try:
        cap = int(pltpu.get_tpu_info().vmem_capacity_bytes)
        if cap > 0:
            return cap
    except Exception:
        pass
    return 64 << 20  # conservative (v7x-sized) fallback


def _vmem_limit(need_bytes):
    cap = _vmem_cap_bytes()
    hi = int(cap * 0.85)               # headroom for compiler scratch / semaphores
    return int(max(min(need_bytes, hi), min(32 << 20, hi)))


def encoder_forward(x, params, n_head):
    B, T, E = x.shape
    HID = params["w1"].shape[1]
    assert E % n_head == 0
    H = n_head
    dh = E // n_head
    scale = 1.0 / (dh ** 0.5)

    # Row-tile quanta of 16 keep bf16 sublane packing happy at larger T.
    TQ1 = _pick_tile(T, 512, 16)       # K1 row tile
    TQ = _pick_tile(T, 256, 8)         # K2 query-row tile (grid axis)
    TK = _pick_tile(T, 256, 16)        # K2 KV tile (grid axis, pipelined)
    HC = _pick_tile(HID, 1024, 128)    # FFN hidden lane chunk
    # NOTE: _pick_tile falls back to the full dim for awkward sizes (prime T,
    # HID not a multiple of 128); the VMEM estimate below covers that case.

    bf16, f32 = jnp.bfloat16, jnp.float32
    ln1_g, ln1_b = params["ln1_g"], params["ln1_b"]
    ln2_g, ln2_b = params["ln2_g"], params["ln2_b"]
    w_kv = jnp.concatenate([params["wk"], params["wv"]], axis=1).astype(bf16)
    b_kv = jnp.concatenate([params["bk"], params["bv"]], axis=1)
    wq_s = (params["wq"] * scale).astype(bf16)       # fold 1/sqrt(dh) into Q proj
    bq_s = params["bq"] * scale
    wo = params["wo"].astype(bf16)
    bo = params["bo"]
    w1, b1 = params["w1"].astype(bf16), params["b1"]
    w2, b2 = params["w2"].astype(bf16), params["b2"]

    def const_spec(arr, grid_rank):
        nd = arr.ndim
        if grid_rank == 2:
            return pl.BlockSpec(arr.shape, lambda b, i, _nd=nd: (0,) * _nd)
        return pl.BlockSpec(arr.shape, lambda b, i, k, _nd=nd: (0,) * _nd)

    f32b, bf16b = 4, 2

    # ---------------- kernel 1: LN1 + fused K|V projection -------------------
    k1_weights = (ln1_g, ln1_b, w_kv, b_kv)
    blk1 = TQ1 * E * f32b + 2 * TQ1 * E * bf16b                 # x in, k/v out
    wb1 = sum(int(w.size) * w.dtype.itemsize for w in k1_weights)
    tmp1 = TQ1 * 2 * E * f32b + 4 * TQ1 * E * bf16b             # kv f32 + relayouts
    vmem1 = _vmem_limit(2 * blk1 + 2 * wb1 + tmp1 + (8 << 20))

    k_hm, v_hm = pl.pallas_call(
        functools.partial(ln_kv_kernel, n_head=n_head),
        out_shape=[jax.ShapeDtypeStruct((B, H, T, dh), bf16),
                   jax.ShapeDtypeStruct((B, H, T, dh), bf16)],
        grid_spec=pltpu.PrefetchScalarGridSpec(
            num_scalar_prefetch=0,
            grid=(B, T // TQ1),
            in_specs=[pl.BlockSpec((1, TQ1, E), lambda b, i: (b, i, 0))]
                     + [const_spec(w, 2) for w in k1_weights],
            out_specs=[pl.BlockSpec((1, H, TQ1, dh), lambda b, i: (b, 0, i, 0)),
                       pl.BlockSpec((1, H, TQ1, dh), lambda b, i: (b, 0, i, 0))]),
        compiler_params=pltpu.CompilerParams(
            dimension_semantics=("parallel", "parallel"),
            vmem_limit_bytes=vmem1),
    )(x, *k1_weights)

    # ---------------- kernel 2: flash attention + Wo + LN2 + FFN -------------
    k2_weights = (ln1_g, ln1_b, wq_s, bq_s, wo, bo, ln2_g, ln2_b, w1, b1, w2, b2)
    blk2 = 2 * TQ * E * f32b + 2 * TK * E * bf16b               # x/out, k/v tiles
    wb2 = sum(int(w.size) * w.dtype.itemsize for w in k2_weights)
    scr2 = TQ * E * bf16b + 2 * H * TQ * f32b + TQ * E * f32b   # q, m, l, acc
    tmp2 = (3 * H * TQ * TK * f32b                              # s, p (+ bf16 copy)
            + 4 * TQ * E * f32b                                 # attn/proj/x1/ffn
            + 2 * TQ * HC * f32b)                               # FFN hidden chunk
    vmem2 = _vmem_limit(2 * blk2 + 2 * wb2 + scr2 + tmp2 + (8 << 20))

    # TODO(synk): on v7x, mark the const weight specs (esp. w1/w2) with
    # pipeline_mode=pl.Buffered(1) to drop their double-buffer copy once
    # single-buffering is verified on this jax revision.
    y = pl.pallas_call(
        functools.partial(attn_ffn_kernel, n_head=n_head, hidden_tile=HC),
        out_shape=jax.ShapeDtypeStruct((B, T, E), x.dtype),
        grid_spec=pltpu.PrefetchScalarGridSpec(
            num_scalar_prefetch=0,
            # Batch axis first so megacore sharding splits B (no duplicated
            # K/V HBM fetch across the two v7x TensorCores); KV axis last and
            # "arbitrary" (online-softmax reduction with resident output).
            grid=(B, T // TQ, T // TK),
            in_specs=[pl.BlockSpec((1, TQ, E), lambda b, i, kv: (b, i, 0)),       # x
                      pl.BlockSpec((1, H, TK, dh), lambda b, i, kv: (b, 0, kv, 0)),  # k
                      pl.BlockSpec((1, H, TK, dh), lambda b, i, kv: (b, 0, kv, 0))]  # v
                     + [const_spec(w, 3) for w in k2_weights],
            out_specs=pl.BlockSpec((1, TQ, E), lambda b, i, kv: (b, i, 0)),
            scratch_shapes=[pltpu.VMEM((H, TQ, dh), bf16),    # q (head-major)
                            pltpu.VMEM((H, TQ, 1), f32),      # m
                            pltpu.VMEM((H, TQ, 1), f32),      # l
                            pltpu.VMEM((H, TQ, dh), f32)]),   # acc
        compiler_params=pltpu.CompilerParams(
            dimension_semantics=("parallel", "parallel", "arbitrary"),
            vmem_limit_bytes=vmem2),
    )(x, k_hm, v_hm, *k2_weights)
    return y


# ---------------------------------------------------------------------------
# Pure-JAX fp32 reference (PyTorch semantics) and parameter init
# ---------------------------------------------------------------------------
def encoder_reference(x, params, n_head):
    B, T, E = x.shape
    dh = E // n_head

    def ln(v, g, b):
        mu = v.mean(-1, keepdims=True)
        var = ((v - mu) ** 2).mean(-1, keepdims=True)
        return (v - mu) / jnp.sqrt(var + LN_EPS) * g + b

    h = ln(x, params["ln1_g"], params["ln1_b"])
    q = h @ params["wq"] + params["bq"]
    k = h @ params["wk"] + params["bk"]
    v = h @ params["wv"] + params["bv"]

    def split(t):
        return t.reshape(B, T, n_head, dh).transpose(0, 2, 1, 3)

    qh, kh, vh = split(q), split(k), split(v)
    s = (qh @ kh.transpose(0, 1, 3, 2)) / jnp.sqrt(jnp.float32(dh))
    p = jax.nn.softmax(s, axis=-1)
    a = (p @ vh).transpose(0, 2, 1, 3).reshape(B, T, E)
    x = x + a @ params["wo"] + params["bo"]
    h2 = ln(x, params["ln2_g"], params["ln2_b"])
    ff = jnp.maximum(h2 @ params["w1"] + params["b1"], 0.0) @ params["w2"] + params["b2"]
    return x + ff


def init_params(key, n_emb):
    """Deterministic synthetic weights (PyTorch Linear W stored transposed
    as (in, out) so the kernel computes x @ W + b)."""
    E, Hd = n_emb, 4 * n_emb
    ks = jax.random.split(key, 12)
    std = 0.02
    return {
        "ln1_g": jnp.ones((1, E), jnp.float32),
        "ln1_b": jnp.zeros((1, E), jnp.float32),
        "wq": std * jax.random.normal(ks[0], (E, E), jnp.float32),
        "bq": std * jax.random.normal(ks[1], (1, E), jnp.float32),
        "wk": std * jax.random.normal(ks[2], (E, E), jnp.float32),
        "bk": std * jax.random.normal(ks[3], (1, E), jnp.float32),
        "wv": std * jax.random.normal(ks[4], (E, E), jnp.float32),
        "bv": std * jax.random.normal(ks[5], (1, E), jnp.float32),
        "wo": std * jax.random.normal(ks[6], (E, E), jnp.float32),
        "bo": std * jax.random.normal(ks[7], (1, E), jnp.float32),
        "ln2_g": jnp.ones((1, E), jnp.float32),
        "ln2_b": jnp.zeros((1, E), jnp.float32),
        "w1": std * jax.random.normal(ks[8], (E, Hd), jnp.float32),
        "b1": std * jax.random.normal(ks[9], (1, Hd), jnp.float32),
        "w2": std * jax.random.normal(ks[10], (Hd, E), jnp.float32),
        "b2": std * jax.random.normal(ks[11], (1, E), jnp.float32),
    }


if __name__ == "__main__":
    # config: n_emb=32, n_head=4, dropout=0.0, bias=True; batch=2, seq=8
    B, T, E, n_head = 2, 8, 32, 4

    key = jax.random.PRNGKey(0)
    kx, kp = jax.random.split(key)
    x = jax.random.normal(kx, (B, T, E), jnp.float32)
    params = init_params(kp, E)

    # TODO(synk): dropout is a no-op here (eval / dropout=0.0); training-mode
    # dropout masks are not implemented.
    fwd = jax.jit(functools.partial(encoder_forward, n_head=n_head))
    y = jax.block_until_ready(fwd(x, params))

    y_ref = encoder_reference(x, params, n_head)
    err = float(jnp.max(jnp.abs(y - y_ref)))

    assert y.shape == (B, T, E)
    assert bool(jnp.all(jnp.isfinite(y)))
    assert err < 5e-2, f"max abs err vs fp32 reference: {err}"  # bf16 drift budget
    print("KERNEL_OK")
</pallas_src>

<mosaic_0001>
module attributes {stable_mosaic.version = 11 : i64} {
  func.func @attn_ffn_kernel(%arg0: i32, %arg1: i32, %arg2: i32, %arg3: memref<1x8x32xf32, #tpu.memory_space<vmem>>, %arg4: memref<1x4x8x8xbf16, #tpu.memory_space<vmem>>, %arg5: memref<1x4x8x8xbf16, #tpu.memory_space<vmem>>, %arg6: memref<1x32xf32, #tpu.memory_space<vmem>>, %arg7: memref<1x32xf32, #tpu.memory_space<vmem>>, %arg8: memref<32x32xbf16, #tpu.memory_space<vmem>>, %arg9: memref<1x32xf32, #tpu.memory_space<vmem>>, %arg10: memref<32x32xbf16, #tpu.memory_space<vmem>>, %arg11: memref<1x32xf32, #tpu.memory_space<vmem>>, %arg12: memref<1x32xf32, #tpu.memory_space<vmem>>, %arg13: memref<1x32xf32, #tpu.memory_space<vmem>>, %arg14: memref<32x128xbf16, #tpu.memory_space<vmem>>, %arg15: memref<1x128xf32, #tpu.memory_space<vmem>>, %arg16: memref<128x32xbf16, #tpu.memory_space<vmem>>, %arg17: memref<1x32xf32, #tpu.memory_space<vmem>>, %arg18: memref<1x8x32xf32, #tpu.memory_space<vmem>>, %arg19: memref<4x8x8xbf16, #tpu.memory_space<vmem>>, %arg20: memref<4x8x1xf32, #tpu.memory_space<vmem>>, %arg21: memref<4x8x1xf32, #tpu.memory_space<vmem>>, %arg22: memref<4x8x8xf32, #tpu.memory_space<vmem>>) attributes {dimension_semantics = [#tpu.dimension_semantics<parallel>, #tpu.dimension_semantics<parallel>, #tpu.dimension_semantics<arbitrary>], iteration_bounds = array<i64: 2, 1, 1>, scalar_prefetch = 0 : i64, scratch_operands = 4 : i64, tpu.core_type = #tpu.core_type<tc>, window_params = [{transform_indices = @transform_0, window_bounds = array<i64: 1, 8, 32>}, {transform_indices = @transform_1, window_bounds = array<i64: 1, 4, 8, 8>}, {transform_indices = @transform_2, window_bounds = array<i64: 1, 4, 8, 8>}, {pipeline_mode = #tpu.pipeline_mode<synchronous>, transform_indices = @transform_3, window_bounds = array<i64: 1, 32>}, {pipeline_mode = #tpu.pipeline_mode<synchronous>, transform_indices = @transform_4, window_bounds = array<i64: 1, 32>}, {pipeline_mode = #tpu.pipeline_mode<synchronous>, transform_indices = @transform_5, window_bounds = array<i64: 32, 32>}, {pipeline_mode = #tpu.pipeline_mode<synchronous>, transform_indices = @transform_6, window_bounds = array<i64: 1, 32>}, {pipeline_mode = #tpu.pipeline_mode<synchronous>, transform_indices = @transform_7, window_bounds = array<i64: 32, 32>}, {pipeline_mode = #tpu.pipeline_mode<synchronous>, transform_indices = @transform_8, window_bounds = array<i64: 1, 32>}, {pipeline_mode = #tpu.pipeline_mode<synchronous>, transform_indices = @transform_9, window_bounds = array<i64: 1, 32>}, {pipeline_mode = #tpu.pipeline_mode<synchronous>, transform_indices = @transform_10, window_bounds = array<i64: 1, 32>}, {pipeline_mode = #tpu.pipeline_mode<synchronous>, transform_indices = @transform_11, window_bounds = array<i64: 32, 128>}, {pipeline_mode = #tpu.pipeline_mode<synchronous>, transform_indices = @transform_12, window_bounds = array<i64: 1, 128>}, {pipeline_mode = #tpu.pipeline_mode<synchronous>, transform_indices = @transform_13, window_bounds = array<i64: 128, 32>}, {pipeline_mode = #tpu.pipeline_mode<synchronous>, transform_indices = @transform_14, window_bounds = array<i64: 1, 32>}, {transform_indices = @transform_15, window_bounds = array<i64: 1, 8, 32>}]} {
    %c0_i32 = arith.constant 0 : i32
    %0 = arith.cmpi eq, %arg2, %c0_i32 : i32
    %1 = arith.extui %0 : i1 to i32
    %c0_i32_0 = arith.constant 0 : i32
    %2 = arith.cmpi ne, %1, %c0_i32_0 : i32
    scf.if %2 {
      %c0_34 = arith.constant 0 : index
      %c0_35 = arith.constant 0 : index
      %c0_36 = arith.constant 0 : index
      %35 = vector.load %arg3[%c0_34, %c0_35, %c0_36] : memref<1x8x32xf32, #tpu.memory_space<vmem>>, vector<1x8x32xf32>
      %36 = vector.shape_cast %35 : vector<1x8x32xf32> to vector<8x32xf32>
      %c0_37 = arith.constant 0 : index
      %c0_38 = arith.constant 0 : index
      %37 = vector.load %arg6[%c0_37, %c0_38] : memref<1x32xf32, #tpu.memory_space<vmem>>, vector<1x32xf32>
      %c0_39 = arith.constant 0 : index
      %c0_40 = arith.constant 0 : index
      %38 = vector.load %arg7[%c0_39, %c0_40] : memref<1x32xf32, #tpu.memory_space<vmem>>, vector<1x32xf32>
      %cst_41 = arith.constant dense<0.000000e+00> : vector<8xf32>
      %39 = vector.multi_reduction <add>, %36, %cst_41 [1] : vector<8x32xf32> to vector<8xf32>
      %40 = vector.shape_cast %39 : vector<8xf32> to vector<8x1xf32>
      %cst_42 = arith.constant 3.200000e+01 : f32
      %41 = vector.broadcast %cst_42 : f32 to vector<8x1xf32>
      %42 = arith.divf %40, %41 : vector<8x1xf32>
      %43 = vector.broadcast %42 : vector<8x1xf32> to vector<8x32xf32>
      %44 = arith.subf %36, %43 : vector<8x32xf32>
      %45 = arith.mulf %44, %44 : vector<8x32xf32>
      %cst_43 = arith.constant dense<0.000000e+00> : vector<8xf32>
      %46 = vector.multi_reduction <add>, %45, %cst_43 [1] : vector<8x32xf32> to vector<8xf32>
      %47 = vector.shape_cast %46 : vector<8xf32> to vector<8x1xf32>
      %cst_44 = arith.constant 3.200000e+01 : f32
      %48 = vector.broadcast %cst_44 : f32 to vector<8x1xf32>
      %49 = arith.divf %47, %48 : vector<8x1xf32>
      %50 = vector.broadcast %42 : vector<8x1xf32> to vector<8x32xf32>
      %51 = arith.subf %36, %50 : vector<8x32xf32>
      %cst_45 = arith.constant 9.99999974E-6 : f32
      %52 = vector.broadcast %cst_45 : f32 to vector<8x1xf32>
      %53 = arith.addf %49, %52 : vector<8x1xf32>
      %54 = math.rsqrt %53 : vector<8x1xf32>
      %55 = vector.broadcast %54 : vector<8x1xf32> to vector<8x32xf32>
      %56 = arith.mulf %51, %55 : vector<8x32xf32>
      %57 = vector.broadcast %37 : vector<1x32xf32> to vector<8x32xf32>
      %58 = arith.mulf %56, %57 : vector<8x32xf32>
      %59 = vector.broadcast %38 : vector<1x32xf32> to vector<8x32xf32>
      %60 = arith.addf %58, %59 : vector<8x32xf32>
      %61 = arith.truncf %60 : vector<8x32xf32> to vector<8x32xbf16>
      %c0_46 = arith.constant 0 : index
      %c0_47 = arith.constant 0 : index
      %62 = vector.load %arg8[%c0_46, %c0_47] : memref<32x32xbf16, #tpu.memory_space<vmem>>, vector<32x32xbf16>
      %cst_48 = arith.constant dense<0.000000e+00> : vector<8x32xf32>
      %63 = tpu.matmul %61, %62, %cst_48 {dimension_numbers = #tpu.dot_dimension_numbers<[1], [0], [0], [1], [0, 0, 1, 1], [], []>} : vector<8x32xbf16>, vector<32x32xbf16>, vector<8x32xf32> -> vector<8x32xf32>
      %c0_49 = arith.constant 0 : index
      %c0_50 = arith.constant 0 : index
      %64 = vector.load %arg9[%c0_49, %c0_50] : memref<1x32xf32, #tpu.memory_space<vmem>>, vector<1x32xf32>
      %65 = vector.broadcast %64 : vector<1x32xf32> to vector<8x32xf32>
      %66 = arith.addf %63, %65 : vector<8x32xf32>
      %67 = arith.truncf %66 : vector<8x32xf32> to vector<8x32xbf16>
      %68 = vector.shape_cast %67 : vector<8x32xbf16> to vector<8x4x8xbf16>
      %69 = tpu.transpose %68, [1, 0, 2] : vector<8x4x8xbf16> -> vector<4x8x8xbf16>
      %c0_51 = arith.constant 0 : index
      %c0_52 = arith.constant 0 : index
      %c0_53 = arith.constant 0 : index
      %70 = vector.load %arg19[%c0_51, %c0_52, %c0_53] : memref<4x8x8xbf16, #tpu.memory_space<vmem>>, vector<4x8x8xbf16>
      tpu.vector_store %arg19[%c0_51, %c0_52, %c0_53], %69 {strides = array<i32>} : memref<4x8x8xbf16, #tpu.memory_space<vmem>>, vector<4x8x8xbf16>,
      %cst_54 = arith.constant 0xFF800000 : f32
      %71 = vector.broadcast %cst_54 : f32 to vector<4x8x1xf32>
      %c0_55 = arith.constant 0 : index
      %c0_56 = arith.constant 0 : index
      %c0_57 = arith.constant 0 : index
      %72 = vector.load %arg20[%c0_55, %c0_56, %c0_57] : memref<4x8x1xf32, #tpu.memory_space<vmem>>, vector<4x8x1xf32>
      tpu.vector_store %arg20[%c0_55, %c0_56, %c0_57], %71 {strides = array<i32>} : memref<4x8x1xf32, #tpu.memory_space<vmem>>, vector<4x8x1xf32>,
      %cst_58 = arith.constant 0.000000e+00 : f32
      %73 = vector.broadcast %cst_58 : f32 to vector<4x8x1xf32>
      %c0_59 = arith.constant 0 : index
      %c0_60 = arith.constant 0 : index
      %c0_61 = arith.constant 0 : index
      %74 = vector.load %arg21[%c0_59, %c0_60, %c0_61] : memref<4x8x1xf32, #tpu.memory_space<vmem>>, vector<4x8x1xf32>
      tpu.vector_store %arg21[%c0_59, %c0_60, %c0_61], %73 {strides = array<i32>} : memref<4x8x1xf32, #tpu.memory_space<vmem>>, vector<4x8x1xf32>,
      %cst_62 = arith.constant 0.000000e+00 : f32
      %75 = vector.broadcast %cst_62 : f32 to vector<4x8x8xf32>
      %c0_63 = arith.constant 0 : index
      %c0_64 = arith.constant 0 : index
      %c0_65 = arith.constant 0 : index
      %76 = vector.load %arg22[%c0_63, %c0_64, %c0_65] : memref<4x8x8xf32, #tpu.memory_space<vmem>>, vector<4x8x8xf32>
      tpu.vector_store %arg22[%c0_63, %c0_64, %c0_65], %75 {strides = array<i32>} : memref<4x8x8xf32, #tpu.memory_space<vmem>>, vector<4x8x8xf32>,
    } else {
    }
    %c0 = arith.constant 0 : index
    %c0_1 = arith.constant 0 : index
    %c0_2 = arith.constant 0 : index
    %c0_3 = arith.constant 0 : index
    %3 = vector.load %arg4[%c0, %c0_1, %c0_2, %c0_3] : memref<1x4x8x8xbf16, #tpu.memory_space<vmem>>, vector<1x4x8x8xbf16>
    %4 = vector.shape_cast %3 : vector<1x4x8x8xbf16> to vector<4x8x8xbf16>
    %c0_4 = arith.constant 0 : index
    %c0_5 = arith.constant 0 : index
    %c0_6 = arith.constant 0 : index
    %c0_7 = arith.constant 0 : index
    %5 = vector.load %arg5[%c0_4, %c0_5, %c0_6, %c0_7] : memref<1x4x8x8xbf16, #tpu.memory_space<vmem>>, vector<1x4x8x8xbf16>
    %6 = vector.shape_cast %5 : vector<1x4x8x8xbf16> to vector<4x8x8xbf16>
    %c0_8 = arith.constant 0 : index
    %c0_9 = arith.constant 0 : index
    %c0_10 = arith.constant 0 : index
    %7 = vector.load %arg19[%c0_8, %c0_9, %c0_10] : memref<4x8x8xbf16, #tpu.memory_space<vmem>>, vector<4x8x8xbf16>
    "tpu.trace_start"() <{level = 10 : i32, message = "hqd,hkd->hqk"}> : () -> ()
    %cst = arith.constant dense<0.000000e+00> : vector<4x8x8xf32>
    %8 = tpu.matmul %7, %4, %cst {dimension_numbers = #tpu.dot_dimension_numbers<[2], [2], [1], [1], [0, 0, 0, 1, 1, 1], [0], [0]>} : vector<4x8x8xbf16>, vector<4x8x8xbf16>, vector<4x8x8xf32> -> vector<4x8x8xf32>
    "tpu.trace_stop"() : () -> ()
    %c0_11 = arith.constant 0 : index
    %c0_12 = arith.constant 0 : index
    %c0_13 = arith.constant 0 : index
    %9 = vector.load %arg20[%c0_11, %c0_12, %c0_13] : memref<4x8x1xf32, #tpu.memory_space<vmem>>, vector<4x8x1xf32>
    %cst_14 = arith.constant dense<0xFF800000> : vector<4x8xf32>
    %10 = vector.multi_reduction <maximumf>, %8, %cst_14 [2] : vector<4x8x8xf32> to vector<4x8xf32>
    %11 = vector.shape_cast %10 : vector<4x8xf32> to vector<4x8x1xf32>
    %12 = arith.maximumf %9, %11 : vector<4x8x1xf32>
    %13 = arith.subf %9, %12 : vector<4x8x1xf32>
    %14 = math.exp %13 : vector<4x8x1xf32>
    %15 = vector.broadcast %12 : vector<4x8x1xf32> to vector<4x8x8xf32>
    %16 = arith.subf %8, %15 : vector<4x8x8xf32>
    %17 = math.exp %16 : vector<4x8x8xf32>
    %c0_15 = arith.constant 0 : index
    %c0_16 = arith.constant 0 : index
    %c0_17 = arith.constant 0 : index
    %18 = vector.load %arg21[%c0_15, %c0_16, %c0_17] : memref<4x8x1xf32, #tpu.memory_space<vmem>>, vector<4x8x1xf32>
    %19 = arith.mulf %14, %18 : vector<4x8x1xf32>
    %cst_18 = arith.constant dense<0.000000e+00> : vector<4x8xf32>
    %20 = vector.multi_reduction <add>, %17, %cst_18 [2] : vector<4x8x8xf32> to vector<4x8xf32>
    %21 = vector.shape_cast %20 : vector<4x8xf32> to vector<4x8x1xf32>
    %22 = arith.addf %19, %21 : vector<4x8x1xf32>
    %c0_19 = arith.constant 0 : index
    %c0_20 = arith.constant 0 : index
    %c0_21 = arith.constant 0 : index
    %23 = vector.load %arg21[%c0_19, %c0_20, %c0_21] : memref<4x8x1xf32, #tpu.memory_space<vmem>>, vector<4x8x1xf32>
    tpu.vector_store %arg21[%c0_19, %c0_20, %c0_21], %22 {strides = array<i32>} : memref<4x8x1xf32, #tpu.memory_space<vmem>>, vector<4x8x1xf32>,
    %c0_22 = arith.constant 0 : index
    %c0_23 = arith.constant 0 : index
    %c0_24 = arith.constant 0 : index
    %24 = vector.load %arg22[%c0_22, %c0_23, %c0_24] : memref<4x8x8xf32, #tpu.memory_space<vmem>>, vector<4x8x8xf32>
    %25 = vector.broadcast %14 : vector<4x8x1xf32> to vector<4x8x8xf32>
    %26 = arith.mulf %25, %24 : vector<4x8x8xf32>
    %27 = arith.truncf %17 : vector<4x8x8xf32> to vector<4x8x8xbf16>
    "tpu.trace_start"() <{level = 10 : i32, message = "hqk,hkd->hqd"}> : () -> ()
    %cst_25 = arith.constant dense<0.000000e+00> : vector<4x8x8xf32>
    %28 = tpu.matmul %27, %6, %cst_25 {dimension_numbers = #tpu.dot_dimension_numbers<[2], [1], [1], [2], [0, 0, 0, 1, 1, 2], [0], [0]>} : vector<4x8x8xbf16>, vector<4x8x8xbf16>, vector<4x8x8xf32> -> vector<4x8x8xf32>
    "tpu.trace_stop"() : () -> ()
    %29 = arith.addf %26, %28 : vector<4x8x8xf32>
    %c0_26 = arith.constant 0 : index
    %c0_27 = arith.constant 0 : index
    %c0_28 = arith.constant 0 : index
    %30 = vector.load %arg22[%c0_26, %c0_27, %c0_28] : memref<4x8x8xf32, #tpu.memory_space<vmem>>, vector<4x8x8xf32>
    tpu.vector_store %arg22[%c0_26, %c0_27, %c0_28], %29 {strides = array<i32>} : memref<4x8x8xf32, #tpu.memory_space<vmem>>, vector<4x8x8xf32>,
    %c0_29 = arith.constant 0 : index
    %c0_30 = arith.constant 0 : index
    %c0_31 = arith.constant 0 : index
    %31 = vector.load %arg20[%c0_29, %c0_30, %c0_31] : memref<4x8x1xf32, #tpu.memory_space<vmem>>, vector<4x8x1xf32>
    tpu.vector_store %arg20[%c0_29, %c0_30, %c0_31], %12 {strides = array<i32>} : memref<4x8x1xf32, #tpu.memory_space<vmem>>, vector<4x8x1xf32>,
    %c0_i32_32 = arith.constant 0 : i32
    %32 = arith.cmpi eq, %arg2, %c0_i32_32 : i32
    %33 = arith.extui %32 : i1 to i32
    %c0_i32_33 = arith.constant 0 : i32
    %34 = arith.cmpi ne, %33, %c0_i32_33 : i32
    scf.if %34 {
      %c0_34 = arith.constant 0 : index
      %c0_35 = arith.constant 0 : index
      %c0_36 = arith.constant 0 : index
      %35 = vector.load %arg22[%c0_34, %c0_35, %c0_36] : memref<4x8x8xf32, #tpu.memory_space<vmem>>, vector<4x8x8xf32>
      %c0_37 = arith.constant 0 : index
      %c0_38 = arith.constant 0 : index
      %c0_39 = arith.constant 0 : index
      %36 = vector.load %arg21[%c0_37, %c0_38, %c0_39] : memref<4x8x1xf32, #tpu.memory_space<vmem>>, vector<4x8x1xf32>
      %37 = tpu.reciprocal %36 {approx = true} : vector<4x8x1xf32> -> vector<4x8x1xf32>
      %38 = vector.broadcast %37 : vector<4x8x1xf32> to vector<4x8x8xf32>
      %39 = arith.mulf %35, %38 : vector<4x8x8xf32>
      %40 = arith.truncf %39 : vector<4x8x8xf32> to vector<4x8x8xbf16>
      %41 = tpu.transpose %40, [1, 0, 2] : vector<4x8x8xbf16> -> vector<8x4x8xbf16>
      %42 = vector.shape_cast %41 : vector<8x4x8xbf16> to vector<8x32xbf16>
      %c0_40 = arith.constant 0 : index
      %c0_41 = arith.constant 0 : index
      %43 = vector.load %arg10[%c0_40, %c0_41] : memref<32x32xbf16, #tpu.memory_space<vmem>>, vector<32x32xbf16>
      %cst_42 = arith.constant dense<0.000000e+00> : vector<8x32xf32>
      %44 = tpu.matmul %42, %43, %cst_42 {dimension_numbers = #tpu.dot_dimension_numbers<[1], [0], [0], [1], [0, 0, 1, 1], [], []>} : vector<8x32xbf16>, vector<32x32xbf16>, vector<8x32xf32> -> vector<8x32xf32>
      %c0_43 = arith.constant 0 : index
      %c0_44 = arith.constant 0 : index
      %45 = vector.load %arg11[%c0_43, %c0_44] : memref<1x32xf32, #tpu.memory_space<vmem>>, vector<1x32xf32>
      %46 = vector.broadcast %45 : vector<1x32xf32> to vector<8x32xf32>
      %47 = arith.addf %44, %46 : vector<8x32xf32>
      %c0_45 = arith.constant 0 : index
      %c0_46 = arith.constant 0 : index
      %c0_47 = arith.constant 0 : index
      %48 = vector.load %arg3[%c0_45, %c0_46, %c0_47] : memref<1x8x32xf32, #tpu.memory_space<vmem>>, vector<1x8x32xf32>
      %49 = vector.shape_cast %48 : vector<1x8x32xf32> to vector<8x32xf32>
      %50 = arith.addf %49, %47 : vector<8x32xf32>
      %c0_48 = arith.constant 0 : index
      %c0_49 = arith.constant 0 : index
      %51 = vector.load %arg12[%c0_48, %c0_49] : memref<1x32xf32, #tpu.memory_space<vmem>>, vector<1x32xf32>
      %c0_50 = arith.constant 0 : index
      %c0_51 = arith.constant 0 : index
      %52 = vector.load %arg13[%c0_50, %c0_51] : memref<1x32xf32, #tpu.memory_space<vmem>>, vector<1x32xf32>
      %cst_52 = arith.constant dense<0.000000e+00> : vector<8xf32>
      %53 = vector.multi_reduction <add>, %50, %cst_52 [1] : vector<8x32xf32> to vector<8xf32>
      %54 = vector.shape_cast %53 : vector<8xf32> to vector<8x1xf32>
      %cst_53 = arith.constant 3.200000e+01 : f32
      %55 = vector.broadcast %cst_53 : f32 to vector<8x1xf32>
      %56 = arith.divf %54, %55 : vector<8x1xf32>
      %57 = vector.broadcast %56 : vector<8x1xf32> to vector<8x32xf32>
      %58 = arith.subf %50, %57 : vector<8x32xf32>
      %59 = arith.mulf %58, %58 : vector<8x32xf32>
      %cst_54 = arith.constant dense<0.000000e+00> : vector<8xf32>
      %60 = vector.multi_reduction <add>, %59, %cst_54 [1] : vector<8x32xf32> to vector<8xf32>
      %61 = vector.shape_cast %60 : vector<8xf32> to vector<8x1xf32>
      %cst_55 = arith.constant 3.200000e+01 : f32
      %62 = vector.broadcast %cst_55 : f32 to vector<8x1xf32>
      %63 = arith.divf %61, %62 : vector<8x1xf32>
      %64 = vector.broadcast %56 : vector<8x1xf32> to vector<8x32xf32>
      %65 = arith.subf %50, %64 : vector<8x32xf32>
      %cst_56 = arith.constant 9.99999974E-6 : f32
      %66 = vector.broadcast %cst_56 : f32 to vector<8x1xf32>
      %67 = arith.addf %63, %66 : vector<8x1xf32>
      %68 = math.rsqrt %67 : vector<8x1xf32>
      %69 = vector.broadcast %68 : vector<8x1xf32> to vector<8x32xf32>
      %70 = arith.mulf %65, %69 : vector<8x32xf32>
      %71 = vector.broadcast %51 : vector<1x32xf32> to vector<8x32xf32>
      %72 = arith.mulf %70, %71 : vector<8x32xf32>
      %73 = vector.broadcast %52 : vector<1x32xf32> to vector<8x32xf32>
      %74 = arith.addf %72, %73 : vector<8x32xf32>
      %75 = arith.truncf %74 : vector<8x32xf32> to vector<8x32xbf16>
      %cst_57 = arith.constant 0.000000e+00 : f32
      %76 = vector.broadcast %cst_57 : f32 to vector<8x32xf32>
      %c0_i32_58 = arith.constant 0 : i32
      %c128_i32 = arith.constant 128 : i32
      %77 = arith.muli %c0_i32_58, %c128_i32 : i32
      %78 = tpu.assume_multiple %77, 128 : i32
      %c0_59 = arith.constant 0 : index
      %79 = arith.index_cast %78 : i32 to index
      %80 = vector.load %arg14[%c0_59, %79] : memref<32x128xbf16, #tpu.memory_space<vmem>>, vector<32x128xbf16>
      %cst_60 = arith.constant dense<0.000000e+00> : vector<8x128xf32>
      %81 = tpu.matmul %75, %80, %cst_60 {dimension_numbers = #tpu.dot_dimension_numbers<[1], [0], [0], [1], [0, 0, 1, 1], [], []>} : vector<8x32xbf16>, vector<32x128xbf16>, vector<8x128xf32> -> vector<8x128xf32>
      %c0_61 = arith.constant 0 : index
      %82 = arith.index_cast %78 : i32 to index
      %83 = vector.load %arg15[%c0_61, %82] : memref<1x128xf32, #tpu.memory_space<vmem>>, vector<1x128xf32>
      %84 = vector.broadcast %83 : vector<1x128xf32> to vector<8x128xf32>
      %85 = arith.addf %81, %84 : vector<8x128xf32>
      %cst_62 = arith.constant 0.000000e+00 : f32
      %86 = vector.broadcast %cst_62 : f32 to vector<8x128xf32>
      %87 = arith.maximumf %85, %86 : vector<8x128xf32>
      %88 = arith.truncf %87 : vector<8x128xf32> to vector<8x128xbf16>
      %89 = arith.index_cast %78 : i32 to index
      %c0_63 = arith.constant 0 : index
      %90 = vector.load %arg16[%89, %c0_63] : memref<128x32xbf16, #tpu.memory_space<vmem>>, vector<128x32xbf16>
      %cst_64 = arith.constant dense<0.000000e+00> : vector<8x32xf32>
      %91 = tpu.matmul %88, %90, %cst_64 {dimension_numbers = #tpu.dot_dimension_numbers<[1], [0], [0], [1], [0, 0, 1, 1], [], []>} : vector<8x128xbf16>, vector<128x32xbf16>, vector<8x32xf32> -> vector<8x32xf32>
      %92 = arith.addf %76, %91 : vector<8x32xf32>
      %c1_i32 = arith.constant 1 : i32
      %93 = arith.addf %50, %92 : vector<8x32xf32>
      %c0_65 = arith.constant 0 : index
      %c0_66 = arith.constant 0 : index
      %94 = vector.load %arg17[%c0_65, %c0_66] : memref<1x32xf32, #tpu.memory_space<vmem>>, vector<1x32xf32>
      %95 = vector.broadcast %94 : vector<1x32xf32> to vector<8x32xf32>
      %96 = arith.addf %93, %95 : vector<8x32xf32>
      %c0_67 = arith.constant 0 : index
      %c0_68 = arith.constant 0 : index
      %c0_69 = arith.constant 0 : index
      %97 = vector.load %arg18[%c0_67, %c0_68, %c0_69] : memref<1x8x32xf32, #tpu.memory_space<vmem>>, vector<1x8x32xf32>
      %98 = vector.shape_cast %97 : vector<1x8x32xf32> to vector<8x32xf32>
      %99 = vector.shape_cast %96 : vector<8x32xf32> to vector<1x8x32xf32>
      tpu.vector_store %arg18[%c0_67, %c0_68, %c0_69], %99 {strides = array<i32>} : memref<1x8x32xf32, #tpu.memory_space<vmem>>, vector<1x8x32xf32>,
    } else {
    }
    return
  }
  func.func @transform_0(%arg0: i32, %arg1: i32, %arg2: i32) -> (i32, i32, i32) {
    %c0_i32 = arith.constant 0 : i32
    %c0_i32_0 = arith.constant 0 : i32
    return %arg0, %arg1, %c0_i32 : i32, i32, i32
  }
  func.func @transform_1(%arg0: i32, %arg1: i32, %arg2: i32) -> (i32, i32, i32, i32) {
    %c0_i32 = arith.constant 0 : i32
    %c0_i32_0 = arith.constant 0 : i32
    %c0_i32_1 = arith.constant 0 : i32
    return %arg0, %c0_i32, %arg2, %c0_i32_0 : i32, i32, i32, i32
  }
  func.func @transform_2(%arg0: i32, %arg1: i32, %arg2: i32) -> (i32, i32, i32, i32) {
    %c0_i32 = arith.constant 0 : i32
    %c0_i32_0 = arith.constant 0 : i32
    %c0_i32_1 = arith.constant 0 : i32
    return %arg0, %c0_i32, %arg2, %c0_i32_0 : i32, i32, i32, i32
  }
  func.func @transform_3(%arg0: i32, %arg1: i32, %arg2: i32) -> (i32, i32) {
    %c0_i32 = arith.constant 0 : i32
    %c0_i32_0 = arith.constant 0 : i32
    %c0_i32_1 = arith.constant 0 : i32
    return %c0_i32, %c0_i32_0 : i32, i32
  }
  func.func @transform_4(%arg0: i32, %arg1: i32, %arg2: i32) -> (i32, i32) {
    %c0_i32 = arith.constant 0 : i32
    %c0_i32_0 = arith.constant 0 : i32
    %c0_i32_1 = arith.constant 0 : i32
    return %c0_i32, %c0_i32_0 : i32, i32
  }
  func.func @transform_5(%arg0: i32, %arg1: i32, %arg2: i32) -> (i32, i32) {
    %c0_i32 = arith.constant 0 : i32
    %c0_i32_0 = arith.constant 0 : i32
    %c0_i32_1 = arith.constant 0 : i32
    return %c0_i32, %c0_i32_0 : i32, i32
  }
  func.func @transform_6(%arg0: i32, %arg1: i32, %arg2: i32) -> (i32, i32) {
    %c0_i32 = arith.constant 0 : i32
    %c0_i32_0 = arith.constant 0 : i32
    %c0_i32_1 = arith.constant 0 : i32
    return %c0_i32, %c0_i32_0 : i32, i32
  }
  func.func @transform_7(%arg0: i32, %arg1: i32, %arg2: i32) -> (i32, i32) {
    %c0_i32 = arith.constant 0 : i32
    %c0_i32_0 = arith.constant 0 : i32
    %c0_i32_1 = arith.constant 0 : i32
    return %c0_i32, %c0_i32_0 : i32, i32
  }
  func.func @transform_8(%arg0: i32, %arg1: i32, %arg2: i32) -> (i32, i32) {
    %c0_i32 = arith.constant 0 : i32
    %c0_i32_0 = arith.constant 0 : i32
    %c0_i32_1 = arith.constant 0 : i32
    return %c0_i32, %c0_i32_0 : i32, i32
  }
  func.func @transform_9(%arg0: i32, %arg1: i32, %arg2: i32) -> (i32, i32) {
    %c0_i32 = arith.constant 0 : i32
    %c0_i32_0 = arith.constant 0 : i32
    %c0_i32_1 = arith.constant 0 : i32
    return %c0_i32, %c0_i32_0 : i32, i32
  }
  func.func @transform_10(%arg0: i32, %arg1: i32, %arg2: i32) -> (i32, i32) {
    %c0_i32 = arith.constant 0 : i32
    %c0_i32_0 = arith.constant 0 : i32
    %c0_i32_1 = arith.constant 0 : i32
    return %c0_i32, %c0_i32_0 : i32, i32
  }
  func.func @transform_11(%arg0: i32, %arg1: i32, %arg2: i32) -> (i32, i32) {
    %c0_i32 = arith.constant 0 : i32
    %c0_i32_0 = arith.constant 0 : i32
    %c0_i32_1 = arith.constant 0 : i32
    return %c0_i32, %c0_i32_0 : i32, i32
  }
  func.func @transform_12(%arg0: i32, %arg1: i32, %arg2: i32) -> (i32, i32) {
    %c0_i32 = arith.constant 0 : i32
    %c0_i32_0 = arith.constant 0 : i32
    %c0_i32_1 = arith.constant 0 : i32
    return %c0_i32, %c0_i32_0 : i32, i32
  }
  func.func @transform_13(%arg0: i32, %arg1: i32, %arg2: i32) -> (i32, i32) {
    %c0_i32 = arith.constant 0 : i32
    %c0_i32_0 = arith.constant 0 : i32
    %c0_i32_1 = arith.constant 0 : i32
    return %c0_i32, %c0_i32_0 : i32, i32
  }
  func.func @transform_14(%arg0: i32, %arg1: i32, %arg2: i32) -> (i32, i32) {
    %c0_i32 = arith.constant 0 : i32
    %c0_i32_0 = arith.constant 0 : i32
    %c0_i32_1 = arith.constant 0 : i32
    return %c0_i32, %c0_i32_0 : i32, i32
  }
  func.func @transform_15(%arg0: i32, %arg1: i32, %arg2: i32) -> (i32, i32, i32) {
    %c0_i32 = arith.constant 0 : i32
    %c0_i32_0 = arith.constant 0 : i32
    return %arg0, %arg1, %c0_i32 : i32, i32, i32
  }
}

module attributes {stable_mosaic.version = 11 : i64} {
  func.func @ln_kv_kernel(%arg0: i32, %arg1: i32, %arg2: memref<1x8x32xf32, #tpu.memory_space<vmem>>, %arg3: memref<1x32xf32, #tpu.memory_space<vmem>>, %arg4: memref<1x32xf32, #tpu.memory_space<vmem>>, %arg5: memref<32x64xbf16, #tpu.memory_space<vmem>>, %arg6: memref<1x64xf32, #tpu.memory_space<vmem>>, %arg7: memref<1x4x8x8xbf16, #tpu.memory_space<vmem>>, %arg8: memref<1x4x8x8xbf16, #tpu.memory_space<vmem>>) attributes {dimension_semantics = [#tpu.dimension_semantics<parallel>, #tpu.dimension_semantics<parallel>], iteration_bounds = array<i64: 2, 1>, scalar_prefetch = 0 : i64, scratch_operands = 0 : i64, tpu.core_type = #tpu.core_type<tc>, window_params = [{transform_indices = @transform_0, window_bounds = array<i64: 1, 8, 32>}, {pipeline_mode = #tpu.pipeline_mode<synchronous>, transform_indices = @transform_1, window_bounds = array<i64: 1, 32>}, {pipeline_mode = #tpu.pipeline_mode<synchronous>, transform_indices = @transform_2, window_bounds = array<i64: 1, 32>}, {pipeline_mode = #tpu.pipeline_mode<synchronous>, transform_indices = @transform_3, window_bounds = array<i64: 32, 64>}, {pipeline_mode = #tpu.pipeline_mode<synchronous>, transform_indices = @transform_4, window_bounds = array<i64: 1, 64>}, {transform_indices = @transform_5, window_bounds = array<i64: 1, 4, 8, 8>}, {transform_indices = @transform_6, window_bounds = array<i64: 1, 4, 8, 8>}]} {
    %c0 = arith.constant 0 : index
    %c0_0 = arith.constant 0 : index
    %c0_1 = arith.constant 0 : index
    %0 = vector.load %arg2[%c0, %c0_0, %c0_1] : memref<1x8x32xf32, #tpu.memory_space<vmem>>, vector<1x8x32xf32>
    %1 = vector.shape_cast %0 : vector<1x8x32xf32> to vector<8x32xf32>
    %c0_2 = arith.constant 0 : index
    %c0_3 = arith.constant 0 : index
    %2 = vector.load %arg3[%c0_2, %c0_3] : memref<1x32xf32, #tpu.memory_space<vmem>>, vector<1x32xf32>
    %c0_4 = arith.constant 0 : index
    %c0_5 = arith.constant 0 : index
    %3 = vector.load %arg4[%c0_4, %c0_5] : memref<1x32xf32, #tpu.memory_space<vmem>>, vector<1x32xf32>
    %cst = arith.constant dense<0.000000e+00> : vector<8xf32>
    %4 = vector.multi_reduction <add>, %1, %cst [1] : vector<8x32xf32> to vector<8xf32>
    %5 = vector.shape_cast %4 : vector<8xf32> to vector<8x1xf32>
    %cst_6 = arith.constant 3.200000e+01 : f32
    %6 = vector.broadcast %cst_6 : f32 to vector<8x1xf32>
    %7 = arith.divf %5, %6 : vector<8x1xf32>
    %8 = vector.broadcast %7 : vector<8x1xf32> to vector<8x32xf32>
    %9 = arith.subf %1, %8 : vector<8x32xf32>
    %10 = arith.mulf %9, %9 : vector<8x32xf32>
    %cst_7 = arith.constant dense<0.000000e+00> : vector<8xf32>
    %11 = vector.multi_reduction <add>, %10, %cst_7 [1] : vector<8x32xf32> to vector<8xf32>
    %12 = vector.shape_cast %11 : vector<8xf32> to vector<8x1xf32>
    %cst_8 = arith.constant 3.200000e+01 : f32
    %13 = vector.broadcast %cst_8 : f32 to vector<8x1xf32>
    %14 = arith.divf %12, %13 : vector<8x1xf32>
    %15 = vector.broadcast %7 : vector<8x1xf32> to vector<8x32xf32>
    %16 = arith.subf %1, %15 : vector<8x32xf32>
    %cst_9 = arith.constant 9.99999974E-6 : f32
    %17 = vector.broadcast %cst_9 : f32 to vector<8x1xf32>
    %18 = arith.addf %14, %17 : vector<8x1xf32>
    %19 = math.rsqrt %18 : vector<8x1xf32>
    %20 = vector.broadcast %19 : vector<8x1xf32> to vector<8x32xf32>
    %21 = arith.mulf %16, %20 : vector<8x32xf32>
    %22 = vector.broadcast %2 : vector<1x32xf32> to vector<8x32xf32>
    %23 = arith.mulf %21, %22 : vector<8x32xf32>
    %24 = vector.broadcast %3 : vector<1x32xf32> to vector<8x32xf32>
    %25 = arith.addf %23, %24 : vector<8x32xf32>
    %26 = arith.truncf %25 : vector<8x32xf32> to vector<8x32xbf16>
    %c0_10 = arith.constant 0 : index
    %c0_11 = arith.constant 0 : index
    %27 = vector.load %arg5[%c0_10, %c0_11] : memref<32x64xbf16, #tpu.memory_space<vmem>>, vector<32x64xbf16>
    %cst_12 = arith.constant dense<0.000000e+00> : vector<8x64xf32>
    %28 = tpu.matmul %26, %27, %cst_12 {dimension_numbers = #tpu.dot_dimension_numbers<[1], [0], [0], [1], [0, 0, 1, 1], [], []>} : vector<8x32xbf16>, vector<32x64xbf16>, vector<8x64xf32> -> vector<8x64xf32>
    %c0_13 = arith.constant 0 : index
    %c0_14 = arith.constant 0 : index
    %29 = vector.load %arg6[%c0_13, %c0_14] : memref<1x64xf32, #tpu.memory_space<vmem>>, vector<1x64xf32>
    %30 = vector.broadcast %29 : vector<1x64xf32> to vector<8x64xf32>
    %31 = arith.addf %28, %30 : vector<8x64xf32>
    %32 = vector.extract_strided_slice %31 {offsets = [0, 0], sizes = [8, 32], strides = [1, 1]} : vector<8x64xf32> to vector<8x32xf32>
    %33 = arith.truncf %32 : vector<8x32xf32> to vector<8x32xbf16>
    %34 = vector.shape_cast %33 : vector<8x32xbf16> to vector<8x4x8xbf16>
    %35 = tpu.transpose %34, [1, 0, 2] : vector<8x4x8xbf16> -> vector<4x8x8xbf16>
    %36 = vector.extract_strided_slice %31 {offsets = [0, 32], sizes = [8, 32], strides = [1, 1]} : vector<8x64xf32> to vector<8x32xf32>
    %37 = arith.truncf %36 : vector<8x32xf32> to vector<8x32xbf16>
    %38 = vector.shape_cast %37 : vector<8x32xbf16> to vector<8x4x8xbf16>
    %39 = tpu.transpose %38, [1, 0, 2] : vector<8x4x8xbf16> -> vector<4x8x8xbf16>
    %c0_15 = arith.constant 0 : index
    %c0_16 = arith.constant 0 : index
    %c0_17 = arith.constant 0 : index
    %c0_18 = arith.constant 0 : index
    %40 = vector.load %arg7[%c0_15, %c0_16, %c0_17, %c0_18] : memref<1x4x8x8xbf16, #tpu.memory_space<vmem>>, vector<1x4x8x8xbf16>
    %41 = vector.shape_cast %40 : vector<1x4x8x8xbf16> to vector<4x8x8xbf16>
    %42 = vector.shape_cast %35 : vector<4x8x8xbf16> to vector<1x4x8x8xbf16>
    tpu.vector_store %arg7[%c0_15, %c0_16, %c0_17, %c0_18], %42 {strides = array<i32>} : memref<1x4x8x8xbf16, #tpu.memory_space<vmem>>, vector<1x4x8x8xbf16>,
    %c0_19 = arith.constant 0 : index
    %c0_20 = arith.constant 0 : index
    %c0_21 = arith.constant 0 : index
    %c0_22 = arith.constant 0 : index
    %43 = vector.load %arg8[%c0_19, %c0_20, %c0_21, %c0_22] : memref<1x4x8x8xbf16, #tpu.memory_space<vmem>>, vector<1x4x8x8xbf16>
    %44 = vector.shape_cast %43 : vector<1x4x8x8xbf16> to vector<4x8x8xbf16>
    %45 = vector.shape_cast %39 : vector<4x8x8xbf16> to vector<1x4x8x8xbf16>
    tpu.vector_store %arg8[%c0_19, %c0_20, %c0_21, %c0_22], %45 {strides = array<i32>} : memref<1x4x8x8xbf16, #tpu.memory_space<vmem>>, vector<1x4x8x8xbf16>,
    return
  }
  func.func @transform_0(%arg0: i32, %arg1: i32) -> (i32, i32, i32) {
    %c0_i32 = arith.constant 0 : i32
    %c0_i32_0 = arith.constant 0 : i32
    return %arg0, %arg1, %c0_i32 : i32, i32, i32
  }
  func.func @transform_1(%arg0: i32, %arg1: i32) -> (i32, i32) {
    %c0_i32 = arith.constant 0 : i32
    %c0_i32_0 = arith.constant 0 : i32
    %c0_i32_1 = arith.constant 0 : i32
    return %c0_i32, %c0_i32_0 : i32, i32
  }
  func.func @transform_2(%arg0: i32, %arg1: i32) -> (i32, i32) {
    %c0_i32 = arith.constant 0 : i32
    %c0_i32_0 = arith.constant 0 : i32
    %c0_i32_1 = arith.constant 0 : i32
    return %c0_i32, %c0_i32_0 : i32, i32
  }
  func.func @transform_3(%arg0: i32, %arg1: i32) -> (i32, i32) {
    %c0_i32 = arith.constant 0 : i32
    %c0_i32_0 = arith.constant 0 : i32
    %c0_i32_1 = arith.constant 0 : i32
    return %c0_i32, %c0_i32_0 : i32, i32
  }
  func.func @transform_4(%arg0: i32, %arg1: i32) -> (i32, i32) {
    %c0_i32 = arith.constant 0 : i32
    %c0_i32_0 = arith.constant 0 : i32
    %c0_i32_1 = arith.constant 0 : i32
    return %c0_i32, %c0_i32_0 : i32, i32
  }
  func.func @transform_5(%arg0: i32, %arg1: i32) -> (i32, i32, i32, i32) {
    %c0_i32 = arith.constant 0 : i32
    %c0_i32_0 = arith.constant 0 : i32
    %c0_i32_1 = arith.constant 0 : i32
    return %arg0, %c0_i32, %arg1, %c0_i32_0 : i32, i32, i32, i32
  }
  func.func @transform_6(%arg0: i32, %arg1: i32) -> (i32, i32, i32, i32) {
    %c0_i32 = arith.constant 0 : i32
    %c0_i32_0 = arith.constant 0 : i32
    %c0_i32_1 = arith.constant 0 : i32
    return %arg0, %c0_i32, %arg1, %c0_i32_0 : i32, i32, i32, i32
  }
}

</mosaic_0001>

<bundles_post_ra>
// kernel: encoder_forward.2
= control target key start
LH: loop header
LB: loop body
LE: loop exit
PB: predicated region body
PF: predicated region fallthrough
CT: control target
= control target key end

     0   :  { %s1020_s21 = smov 0   ;;  %s1022_s22 = smov 0   ;;  %s1134_s0 = inlined_call_operand.vmem [shape: f32[2,8,32], index: 0, kind: input, shape index: {}]   ;;  %s1135_s1 = inlined_call_operand.vmem [shape: f32[1,32], index: 1, kind: input, shape index: {}]   ;;  %s1136_s2 = inlined_call_operand.vmem [shape: f32[1,32], index: 2, kind: input, shape index: {}]   ;;  %s1137_s3 = inlined_call_operand.vmem [shape: bf16[32,64], index: 3, kind: input, shape index: {}]   ;;  %s1138_s4 = inlined_call_operand.vmem [shape: f32[1,64], index: 4, kind: input, shape index: {}]   ;;  %s1139_s5 = inlined_call_operand.vmem [shape: bf16[2,4,8,8], index: 5, kind: output, shape index: {0}]   ;;  %s1140_s6 = inlined_call_operand.vmem [shape: bf16[2,4,8,8], index: 6, kind: output, shape index: {1}]  }
   0x1   :  { %s1024_s23 = smov 0  }
   0x2 LB: > { %s29_s24 = sadd.s32 1, %s970_s22  ;;  %p888_p0 = scmp.ge.s32.totalorder %s974_s23, 1  ;;  %s974_s23 = sphi %s1024_s23, %s17_s23   ;;  %s970_s22 = sphi %s1022_s22, %s1142_s22   ;;  %s966_s21 = sphi %s1020_s21, %s1141_s21  }
   0x3   : > { %p31_p1 = scmp.ge.s32.totalorder %s29_s24, 2  ;;  %p235_p2 = scmp.lt.s32.totalorder %s974_s23, 3 }
   0x5   : > { %s1144_s24 = smov (%p31_p1, %s29_s24), 0  ;;  %p236_p3 = pnand %p888_p0, %p235_p2 }
   0x6   : > { %p278_p4 = scmp.lt.s32.totalorder (!%p236_p3), %s966_s21, 1  ;;  %vm305_vm0 = vcmask (!%p236_p3), 261120   ;;  %v948_v7 = vld [vmem:[%s1137_s3] sm:$0xff] (!%p236_p3)   ;;  %v976_v8 = vmov (!%p236_p3), 0.0   ;;  %vm977_vm1 = vmmov (!%p236_p3), 0   ;;  %v949_v9 = vld [vmem:[%s1137_s3 + $0x8] sm:$0xff] (!%p236_p3)   ;;  %v412_v29 = vlaneseq (!%p236_p3) }
   0x7   : > { %239 = sbr.rel (%p236_p3) target bundleno = 815 (0x32f), region = 40  ;;  %907 = vmatprep.subr.bf16.mxu0 (!%p236_p3), %v976_v8  ;;  %911 = vmatprep.mubr.msk.bf16.mxu0 (!%p236_p3), %vm977_vm1, %v976_v8  ;;  %v894_v14 = vld [vmem:[%s1135_s1] ss:$0 sm:$0xff] (!%p236_p3)  ;;  %s978_s15 = smov (!%p236_p3), 104   ;;  %v982_v27 = vmov (!%p236_p3), 1983009808  }
   0x8   : > { %908 = vmatpush3.bf16.msra.mxu0 (!%p236_p3), %v948_v7  ;;  %v895_v16 = vld [vmem:[%s1136_s2] ss:$0 sm:$0xff] (!%p236_p3)  ;;  %s979_s16 = smov (!%p236_p3), 120   ;;  %s980_s17 = smov (!%p236_p3), 112   ;;  %v410_v28 = vunpack.c.l.s4 (!%p236_p3), %v982_v27  ;;  %v983_v30 = vmov (!%p236_p3), 1934713408  }
   0x9   : > { %909 = vmatprep.subr.bf16.mxu0 (!%p236_p3), %v976_v8  ;;  %v896_v20 = vld [vmem:[%s1138_s4] ss:$0 sm:$0xff] (!%p236_p3)  ;;  %s981_s18 = smov (!%p236_p3), 96   ;;  %v427_v31 = vunpack.c.l.s4 (!%p236_p3), %v983_v30  ;;  %v413_v33 = vshrl.u32 (!%p236_p3), %v412_v29, 7  ;;  %v984_v50 = vmov (!%p236_p3), 0   ;;  %vm748_vm2 = vcmask (!%p236_p3), 60416  }
   0xa   : > { %v411_v32 = vunpack.c.0.s8 (!%p236_p3), %v410_v28 }
   0xb   : > { %v428_v34 = vunpack.c.0.s8 (!%p236_p3), %v427_v31 }
   0xc   : > { %910 = vmatpush3.bf16.msra.mxu0 (!%p236_p3), %v949_v9  ;;  %v1062_v35 = vsub.s32 (!%p236_p3), %v411_v32, %v413_v33 }
   0xd   : > { %v1065_v39 = vsub.s32 (!%p236_p3), %v428_v34, %v413_v33 }
   0xe   : > { %s1146_s21 = smov (!%p278_p4, %s966_s21), 1 }
   0xf   : > { %s889_s25 = sshll.u32 %s1146_s21, 3  ;;  %s902_s19 = sshll.u32 %s1146_s21, 4 }
  0x10   : > { %s284_s28 = scalar_lea.vmem %s1134_s0, %s889_s25  ;;  %s292_s26 = scalar_lea.vmem %s1139_s5, %s902_s19 }
  0x11   : > { %v302_v0 = vld [vmem:[%s284_s28] sm:$0xff]  ;;  %s300_s29 = scalar_lea.vmem %s1140_s6, %s902_s19 }
  0x12   : > { %v306_v1 = vsel %vm305_vm0, %v302_v0, 0.0 }
  0x13   : > { %307 = vadd.xlane.f32.xlu0 %v306_v1 }
  0xa0   : > { %v308_v2 = vpop.xlane.xlu0 %307 }
  0xa1   : > { %v310_v3 = vmul.f32 0.03125, %v308_v2 }
  0xa3   : > { %v311_v4 = vsub.f32 %v302_v0, %v310_v3 }
  0xa5   : > { %v312_v5 = vmul.f32 %v311_v4, %v311_v4 }
  0xa7   : > { %v313_v6 = vsel %vm305_vm0, %v312_v5, 0.0 }
  0xa8   : > { %314 = vadd.xlane.f32.xlu0 %v313_v6 }
 0x135   : > { %v315_v10 = vpop.xlane.xlu0 %314 }
 0x136   : > { %v316_v11 = vmul.f32 0.03125, %v315_v10 }
 0x138   : > { %v317_v12 = vadd.f32 1e-05, %v316_v11 }
 0x13a   : > { %950 = vrsqrt.f32 %v317_v12 }
 0x144   : > { %v951_v13 = vpop.eup %950 }
 0x145   : > { %v319_v15 = vmul.f32 %v951_v13, %v311_v4 }
 0x147   : > { %v326_v17 = vmul.f32 %v894_v14, %v319_v15 }
 0x149   : > { %v333_v18 = vadd.f32 %v895_v16, %v326_v17 }
 0x14b   : > { %v334_v19 = vpack.c.bf16 %v333_v18, %v333_v18 }
 0x14d   : > { %912 = vmatmul.mubr.msk.bf16.vlgmr.msra.gmra.mrb[0].mxu0 %vm305_vm0, %v334_v19 }
 0x220   : > { %v395_v21 = vpop.f32.mrb[0].mxu0 }
 0x221   : > { %v396_v22 = vadd.f32 %v896_v20, %v395_v21  ;;  %v913_v23 = vpop.f32.mrb[1].mxu0 }
 0x222   : > { %v398_v24 = vpop.f32.mrb[2].mxu0 }
 0x223   : > { %v401_v25 = vpack.c.bf16 %v396_v22, %v396_v22  ;;  %v914_v26 = vpop.f32.mrb[3].mxu0 }
 0x225   : > { %407 = vrot.lane.b32.xlu0 %v401_v25, %s978_s15  ;;  %403 = vrot.lane.b32.xlu1 %v401_v25, %s979_s16  ;;  %v415_v46 = vrot.slane %v401_v25, %v1062_v35 }
 0x229   : > { %405 = vrot.lane.b32.xlu1 %v401_v25, %s980_s17 }
 0x22d   : > { %574 = vrot.lane.b32.xlu1 %v401_v25, %s981_s18 }
 0x297   : > { %v408_v36 = vpop.permute.xlu0 %407  ;;  %v404_v37 = vpop.permute.xlu1 %403 }
 0x298   : > { %v457_v38 = vrot.slane %v408_v36, %v1062_v35  ;;  %v449_v40 = vrot.slane %v404_v37, %v1062_v35  ;;  %576 = vrot.lane.b32.xlu1 %v404_v37, %s981_s18 }
 0x29a   : > { %v458_v41 = vcombine.low %v449_v40, %v457_v38  ;;  %v459_v42 = vcombine.high %v449_v40, %v457_v38 }
 0x29b   : > { %v406_v43 = vpop.permute.xlu1 %405 }
 0x29c   : > { %v466_v44 = vrot.slane %v458_v41, %v1065_v39  ;;  %v423_v45 = vrot.slane %v406_v43, %v1062_v35  ;;  %578 = vrot.lane.b32.xlu1 %v406_v43, %s981_s18  ;;  %v473_v47 = vrot.slane %v459_v42, %v1065_v39 }
 0x29e   : > { %v424_v48 = vcombine.low %v415_v46, %v423_v45  ;;  %v425_v49 = vcombine.high %v415_v46, %v423_v45  ;;  %v474_v51 = vcombine.high %v466_v44, %v984_v50  ;;  %v475_v54 = vcombine.high %v473_v47, %v984_v50 }
 0x29f   : > { %v481_v55 = vshrl.u32 %v466_v44, 16  ;;  %v497_v61 = vshrl.u32 %v473_v47, 16  ;;  %v575_v31 = vpop.permute.xlu1 %574 }
 0x2a0   : > { %580 = vrot.lane.b32.xlu1 %v408_v36, %s981_s18  ;;  %v432_v52 = vrot.slane %v424_v48, %v1065_v39  ;;  %v439_v53 = vrot.slane %v425_v49, %v1065_v39  ;;  %v489_v60 = vshrl.u32 %v474_v51, 16  ;;  %v505_v4 = vshrl.u32 %v475_v54, 16 }
 0x2a1   : > { %v589_v34 = vrot.slane %v575_v31, %v1062_v35 }
 0x2a2   : > { %v440_v56 = vcombine.high %v432_v52, %v984_v50  ;;  %v441_v57 = vcombine.high %v439_v53, %v984_v50  ;;  %v478_v58 = vpack.i.b16 %v466_v44, %v432_v52  ;;  %v480_v59 = vshrl.u32 %v432_v52, 16 }
 0x2a3   : > { %v494_v62 = vpack.i.b16 %v473_v47, %v439_v53  ;;  %v496_v63 = vshrl.u32 %v439_v53, 16 }
 0x2a4   : > { %v482_v0 = vpack.i.b16 %v481_v55, %v480_v59  ;;  %v486_v1 = vpack.i.b16 %v474_v51, %v440_v56  ;;  %v488_v2 = vshrl.u32 %v440_v56, 16  ;;  %v502_v3 = vpack.i.b16 %v475_v54, %v441_v57 }
 0x2a5   : > { %v498_v5 = vpack.i.b16 %v497_v61, %v496_v63  ;;  %v504_v6 = vshrl.u32 %v441_v57, 16  ;;  %v508_v7 = vcombine.low %v478_v58, %v494_v62 }
 0x2a6   : > { %v490_v8 = vpack.i.b16 %v489_v60, %v488_v2  ;;  %v516_v9 = vcombine.low %v486_v1, %v502_v3 }
 0x2a7   : > { %v506_v10 = vpack.i.b16 %v505_v4, %v504_v6  ;;  %v533_v11 = vcombine.low %v482_v0, %v498_v5  ;;  %v515_v12 = vrot.slane %v508_v7, %v1062_v35 }
 0x2a8   : > { %v523_v13 = vrot.slane %v516_v9, %v1062_v35 }
 0x2a9   : > { %v541_v14 = vcombine.low %v490_v8, %v506_v10  ;;  %v540_v16 = vrot.slane %v533_v11, %v1062_v35 }
 0x2aa   : > { %v524_v15 = vcombine.low %v515_v12, %v523_v13 }
 0x2ab   : > { %v548_v17 = vrot.slane %v541_v14, %v1062_v35 }
 0x2ac   : > { %v531_v18 = vrot.slane %v524_v15, %v1065_v39 }
 0x2ad   : > { %v549_v19 = vcombine.low %v540_v16, %v548_v17 }
 0x2ae   : > { %v532_v20 = vcombine.high %v531_v18, %v984_v50  ;;  %v562_v24 = vshrl.u32 %v531_v18, 16 }
 0x2af   : > { %v556_v21 = vrot.slane %v549_v19, %v1065_v39 }
 0x2b0   : > { %v570_v28 = vshrl.u32 %v532_v20, 16 }
 0x2b1   : > { %v557_v22 = vcombine.high %v556_v21, %v984_v50  ;;  %v560_v23 = vpack.i.b16 %v556_v21, %v531_v18  ;;  %v563_v25 = vshrl.u32 %v556_v21, 16 }
 0x2b3   : > { %v564_v26 = vpack.i.b16 %v563_v25, %v562_v24  ;;  %v568_v27 = vpack.i.b16 %v557_v22, %v532_v20  ;;  %v571_v29 = vshrl.u32 %v557_v22, 16  ;;  %749 = vst.msk [vmem:[%s292_s26] sm:$0xf] %vm748_vm2, %v560_v23 }
 0x2b5   : > { %v572_v30 = vpack.i.b16 %v571_v29, %v570_v28  ;;  %750 = vst.msk [vmem:[%s292_s26 + $0x4] sm:$0xf] %vm748_vm2, %v564_v26  ;;  %751 = vst.msk [vmem:[%s292_s26 + $0x8] sm:$0xf] %vm748_vm2, %v568_v27 }
 0x2b7   : > { %752 = vst.msk [vmem:[%s292_s26 + $0xc] sm:$0xf] %vm748_vm2, %v572_v30 }
 0x30a   : > { %v577_v32 = vpop.permute.xlu1 %576 }
 0x30b   : > { %v623_v43 = vrot.slane %v577_v32, %v1062_v35 }
 0x30e   : > { %v579_v33 = vpop.permute.xlu1 %578 }
 0x30f   : > { %v597_v36 = vrot.slane %v579_v33, %v1062_v35 }
 0x311   : > { %v598_v37 = vcombine.low %v589_v34, %v597_v36  ;;  %v599_v38 = vcombine.high %v589_v34, %v597_v36 }
 0x312   : > { %v581_v40 = vpop.permute.xlu1 %580 }
 0x313   : > { %v606_v41 = vrot.slane %v598_v37, %v1065_v39  ;;  %v631_v42 = vrot.slane %v581_v40, %v1062_v35  ;;  %v613_v44 = vrot.slane %v599_v38, %v1065_v39 }
 0x315   : > { %v632_v45 = vcombine.low %v623_v43, %v631_v42  ;;  %v633_v46 = vcombine.high %v623_v43, %v631_v42  ;;  %v614_v47 = vcombine.high %v606_v41, %v984_v50  ;;  %v615_v51 = vcombine.high %v613_v44, %v984_v50 }
 0x316   : > { %v654_v52 = vshrl.u32 %v606_v41, 16  ;;  %v670_v58 = vshrl.u32 %v613_v44, 16 }
 0x317   : > { %v640_v48 = vrot.slane %v632_v45, %v1065_v39  ;;  %v647_v49 = vrot.slane %v633_v46, %v1065_v39  ;;  %v662_v57 = vshrl.u32 %v614_v47, 16  ;;  %v678_v1 = vshrl.u32 %v615_v51, 16 }
 0x319   : > { %v648_v53 = vcombine.high %v640_v48, %v984_v50  ;;  %v649_v54 = vcombine.high %v647_v49, %v984_v50  ;;  %v652_v55 = vpack.i.b16 %v640_v48, %v606_v41  ;;  %v655_v56 = vshrl.u32 %v640_v48, 16 }
 0x31a   : > { %v668_v59 = vpack.i.b16 %v647_v49, %v613_v44  ;;  %v671_v60 = vshrl.u32 %v647_v49, 16 }
 0x31b   : > { %v656_v61 = vpack.i.b16 %v655_v56, %v654_v52  ;;  %v660_v62 = vpack.i.b16 %v648_v53, %v614_v47  ;;  %v663_v63 = vshrl.u32 %v648_v53, 16  ;;  %v676_v0 = vpack.i.b16 %v649_v54, %v615_v51 }
 0x31c   : > { %v672_v2 = vpack.i.b16 %v671_v60, %v670_v58  ;;  %v679_v3 = vshrl.u32 %v649_v54, 16  ;;  %v682_v4 = vcombine.low %v652_v55, %v668_v59 }
 0x31d   : > { %v664_v5 = vpack.i.b16 %v663_v63, %v662_v57  ;;  %v690_v6 = vcombine.low %v660_v62, %v676_v0 }
 0x31e   : > { %v680_v7 = vpack.i.b16 %v679_v3, %v678_v1  ;;  %v707_v8 = vcombine.low %v656_v61, %v672_v2  ;;  %v689_v9 = vrot.slane %v682_v4, %v1062_v35 }
 0x31f   : > { %v697_v10 = vrot.slane %v690_v6, %v1062_v35 }
 0x320   : > { %v715_v11 = vcombine.low %v664_v5, %v680_v7  ;;  %v714_v13 = vrot.slane %v707_v8, %v1062_v35 }
 0x321   : > { %v698_v12 = vcombine.low %v689_v9, %v697_v10 }
 0x322   : > { %v722_v14 = vrot.slane %v715_v11, %v1062_v35 }
 0x323   : > { %v705_v15 = vrot.slane %v698_v12, %v1065_v39 }
 0x324   : > { %v723_v16 = vcombine.low %v714_v13, %v722_v14 }
 0x325   : > { %v706_v17 = vcombine.high %v705_v15, %v984_v50  ;;  %v736_v21 = vshrl.u32 %v705_v15, 16 }
 0x326   : > { %v730_v18 = vrot.slane %v723_v16, %v1065_v39 }
 0x327   : > { %v744_v35 = vshrl.u32 %v706_v17, 16 }
 0x328   : > { %v731_v19 = vcombine.high %v730_v18, %v984_v50  ;;  %v734_v20 = vpack.i.b16 %v730_v18, %v705_v15  ;;  %v737_v22 = vshrl.u32 %v730_v18, 16 }
 0x32a   : > { %v738_v23 = vpack.i.b16 %v737_v22, %v736_v21  ;;  %v742_v24 = vpack.i.b16 %v731_v19, %v706_v17  ;;  %v745_v25 = vshrl.u32 %v731_v19, 16  ;;  %753 = vst.msk [vmem:[%s300_s29] sm:$0xf] %vm748_vm2, %v734_v20 }
 0x32c   : > { %v746_v26 = vpack.i.b16 %v745_v25, %v744_v35  ;;  %754 = vst.msk [vmem:[%s300_s29 + $0x4] sm:$0xf] %vm748_vm2, %v738_v23  ;;  %755 = vst.msk [vmem:[%s300_s29 + $0x8] sm:$0xf] %vm748_vm2, %v742_v24 }
 0x32e   : > { %756 = vst.msk [vmem:[%s300_s29 + $0xc] sm:$0xf] %vm748_vm2, %v746_v26 }
 0x32f PF: > { %s17_s23 = sadd.s32 1, %s974_s23   ;;  %s1141_s21 = smov %s970_s22 }
 0x330   : > { %p14_p5 = scmp.ge.s32.totalorder %s17_s23, 4   ;;  %s1142_s22 = smov %s1144_s24 }
 0x332   :  { %16 = sbr.rel (!%p14_p5) target bundleno = 2 (0x2), region = 82 }

// kernel: encoder_forward.3
= control target key start
LH: loop header
LB: loop body
LE: loop exit
PB: predicated region body
PF: predicated region fallthrough
CT: control target
= control target key end

     0   :  { %s2900_s0 = inlined_call_operand.vmem [shape: f32[2,8,32], index: 0, kind: input, shape index: {}]   ;;  %s2901_s1 = inlined_call_operand.vmem [shape: bf16[2,4,8,8], index: 1, kind: input, shape index: {}]   ;;  %s2902_s2 = inlined_call_operand.vmem [shape: bf16[2,4,8,8], index: 2, kind: input, shape index: {}]   ;;  %s2903_s3 = inlined_call_operand.vmem [shape: f32[1,32], index: 3, kind: input, shape index: {}]   ;;  %s2904_s4 = inlined_call_operand.vmem [shape: f32[1,32], index: 4, kind: input, shape index: {}]   ;;  %s2905_s5 = inlined_call_operand.vmem [shape: bf16[32,32], index: 5, kind: input, shape index: {}]   ;;  %s2906_s6 = inlined_call_operand.vmem [shape: f32[1,32], index: 6, kind: input, shape index: {}]   ;;  %s2907_s7 = inlined_call_operand.vmem [shape: bf16[32,32], index: 7, kind: input, shape index: {}]   ;;  %s2908_s8 = inlined_call_operand.vmem [shape: f32[1,32], index: 8, kind: input, shape index: {}]   ;;  %s2909_s9 = inlined_call_operand.vmem [shape: f32[1,32], index: 9, kind: input, shape index: {}]   ;;  %s2910_s10 = inlined_call_operand.vmem [shape: f32[1,32], index: 10, kind: input, shape index: {}]   ;;  %s2911_s11 = inlined_call_operand.vmem [shape: bf16[32,128], index: 11, kind: input, shape index: {}]   ;;  %s2912_s12 = inlined_call_operand.vmem [shape: f32[1,128], index: 12, kind: input, shape index: {}]   ;;  %s2913_s13 = inlined_call_operand.vmem [shape: bf16[128,32], index: 13, kind: input, shape index: {}]   ;;  %s2914_s14 = inlined_call_operand.vmem [shape: f32[1,32], index: 14, kind: input, shape index: {}]   ;;  %s2915_s15 = inlined_call_operand.hbm [shape: f32[2,8,32], index: 15, kind: output, shape index: {}]  }
   0x1   :  { %2918 = sst [smem:[#allocation11_spill]] %s2900_s0 }
   0x2   :  { %2919 = sst [smem:[#allocation12_spill]] %s2901_s1 }
   0x3   :  { %2920 = sst [smem:[#allocation13_spill]] %s2903_s3 }
   0x4   :  { %2921 = sst [smem:[#allocation14_spill]] %s2904_s4 }
   0x5   :  { %20 = vsyncpa [#allocation7], 0 }
   0x6   :  { %22 = vsyncpa [#allocation7 + $0x1], 0  ;;  %s2481_s18 = smov 0   ;;  %s2483_s19 = smov 0  }
   0x7   :  { %s2485_s20 = smov 0   ;;  %s2487_s21 = smov 0  }
   0x8   :  { %s2489_s22 = smov 0   ;;  %s2491_s23 = smov 0  }
   0x9 LB: > { %2922 = sst [smem:[#allocation9_spill]] %s2382_s22  ;;  %s2021_s24 = sadd.s32 4294967295, %s2386_s23   ;;  %s2386_s23 = sphi %s2491_s23, %s28_s23   ;;  %s2382_s22 = sphi %s2489_s22, %s2931_s22   ;;  %s2378_s21 = sphi %s2487_s21, %s2930_s21   ;;  %s2374_s20 = sphi %s2485_s20, %s2934_s20   ;;  %s2370_s19 = sphi %s2483_s19, %s2933_s19   ;;  %s2366_s18 = sphi %s2481_s18, %s2932_s18  }
   0xa   : > { %s2022_s25 = sadd.s32 4294967294, %s2386_s23   ;;  %s47_s26 = sadd.s32 1, %s2382_s22 }
   0xb   : > { %s392_s27 = sadd.s32 1, %s2374_s20  ;;  %p49_p0 = scmp.ge.s32.totalorder %s47_s26, 2 }
   0xc   : > { %p402_p1 = scmp.ne.s32.totalorder %s2374_s20, %s2370_s19  ;;  %p403_p2 = scmp.eq.s32.totalorder %s2021_s24, 1 }
   0xd   : > { %p408_p3 = scmp.ne.s32.totalorder %s2370_s19, %s2366_s18  ;;  %s2936_s26 = smov (%p49_p0, %s47_s26), 0 }
   0xe   : > { %2923 = sst [smem:[#allocation10_spill]] %s2936_s26  ;;  %p2521_p4 = por %p403_p2, %p402_p1 }
   0xf   : > { %p409_p5 = scmp.eq.s32.totalorder %s2022_s25, 1  ;;  %s387_s29 = ssub.s32 %s2382_s22, %s2936_s26 }
  0x10   : > { %p2025_p6 = scmp.ge.s32.totalorder %s2386_s23, 1  ;;  %p390_p7 = scmp.eq.s32.totalorder %s387_s29, 0 }
  0x11   : > { %p2528_p8 = por %p409_p5, %p408_p3  ;;  %p495_p9 = scmp.lt.s32.totalorder %s2386_s23, 3 }
  0x12   : > { %s2534_s16 = scalar_select %p390_p7, %s2374_s20, %s392_s27  }
  0x13   : > { %p496_p10 = pnand %p2025_p6, %p495_p9 }
  0x14   : > { %p561_p11 = scmp.lt.s32.totalorder (!%p496_p10), %s2378_s21, 1  ;;  %vm592_vm0 = vcmask (!%p496_p10), 261120   ;;  %s2926_s0 = sld [smem:[#allocation11_spill]] (!%p496_p10)  ;;  %v2266_v7 = vld [vmem:[%s2905_s5] sm:$0xff] (!%p496_p10)   ;;  %v2388_v8 = vmov (!%p496_p10), 0.0   ;;  %vm2389_vm1 = vmmov (!%p496_p10), 0   ;;  %v699_v34 = vlaneseq (!%p496_p10) }
  0x15   : > { %499 = sbr.rel (%p496_p10) target bundleno = 2650 (0xa5a), region = 80  ;;  %2105 = vmatprep.subr.bf16.mxu0 (!%p496_p10), %v2388_v8  ;;  %2109 = vmatprep.mubr.msk.bf16.mxu0 (!%p496_p10), %vm2389_vm1, %v2388_v8  ;;  %v2267_v9 = vld [vmem:[%s2905_s5 + $0x8] sm:$0xff] (!%p496_p10)   ;;  %s2927_s3 = sld [smem:[#allocation13_spill]] (!%p496_p10)  ;;  %v2390_v20 = vmov (!%p496_p10), 0   ;;  %v2034_v21 = vld [vmem:[%s2906_s6] ss:$0 sm:$0xff] (!%p496_p10) }
  0x16   : > { %2106 = vmatpush3.bf16.msra.mxu0 (!%p496_p10), %v2266_v7  ;;  %2125 = vmatprep.subr.bf16.mxu1 (!%p496_p10), %v2388_v8  ;;  %s2928_s4 = sld [smem:[#allocation14_spill]] (!%p496_p10)  ;;  %s2391_s22 = smov (!%p496_p10), 104   ;;  %vm875_vm2 = vcmask (!%p496_p10), 64512   ;;  %v2394_v32 = vmov (!%p496_p10), 1983009808   ;;  %v700_v38 = vshrl.u32 (!%p496_p10), %v699_v34, 7 }
  0x17   : > { %2107 = vmatprep.subr.bf16.mxu0 (!%p496_p10), %v2388_v8  ;;  %2127 = vmatprep.mubr.msk.bf16.mxu1 (!%p496_p10), %vm2389_vm1, %v2388_v8  ;;  %s2392_s25 = smov (!%p496_p10), 120   ;;  %s2929_s1 = sld [smem:[#allocation12_spill]] (!%p496_p10)  ;;  %876 = vst.msk [vmem:[#allocation5] sm:$0xff] (!%p496_p10), %vm875_vm2, %v2388_v8  ;;  %877 = vst.msk [vmem:[#allocation5 + $0x8] sm:$0xff] (!%p496_p10), %vm875_vm2, %v2388_v8  ;;  %v697_v33 = vunpack.c.l.s4 (!%p496_p10), %v2394_v32  ;;  %v2395_v35 = vmov (!%p496_p10), 1934713408  }
  0x18   : > { %2264 = vset.pattern.permute.xlu1 (!%p496_p10), %v2390_v20  ;;  %2265 = vset.pattern.permute.xlu0 (!%p496_p10), %v2390_v20  ;;  %878 = vst.msk [vmem:[#allocation5 + $0x10] sm:$0xff] (!%p496_p10), %vm875_vm2, %v2388_v8  ;;  %879 = vst.msk [vmem:[#allocation5 + $0x18] sm:$0xff] (!%p496_p10), %vm875_vm2, %v2388_v8  ;;  %v714_v36 = vunpack.c.l.s4 (!%p496_p10), %v2395_v35  ;;  %vm861_vm3 = vcmask (!%p496_p10), 60416   ;;  %vm866_vm4 = vcmask (!%p496_p10), 7168   ;;  %vm1205_vm5 = vcmask (!%p496_p10), 1043456  }
  0x19   : > { %v698_v37 = vunpack.c.0.s8 (!%p496_p10), %v697_v33  ;;  %871 = vst.msk [vmem:[#allocation4] sm:$0xff] (!%p496_p10), %vm866_vm4, %v2388_v8  ;;  %872 = vst.msk [vmem:[#allocation4 + $0x8] sm:$0xff] (!%p496_p10), %vm866_vm4, %v2388_v8  ;;  %vm1609_vm6 = vcmask (!%p496_p10), 130048   ;;  %vm1612_vm7 = vcmask (!%p496_p10), 195584  }
  0x1a   : > { %2108 = vmatpush3.bf16.msra.mxu0 (!%p496_p10), %v2267_v9  ;;  %v715_v39 = vunpack.c.0.s8 (!%p496_p10), %v714_v36  ;;  %873 = vst.msk [vmem:[#allocation4 + $0x10] sm:$0xff] (!%p496_p10), %vm866_vm4, %v2388_v8  ;;  %874 = vst.msk [vmem:[#allocation4 + $0x18] sm:$0xff] (!%p496_p10), %vm866_vm4, %v2388_v8 }
  0x1b   : > { %2113 = vmatprep.subr.bf16.mxu0 (!%p496_p10), %v2388_v8  ;;  %v2032_v14 = vld [vmem:[%s2927_s3] ss:$0 sm:$0xff] (!%p496_p10)  ;;  %v2600_v40 = vsub.s32 (!%p496_p10), %v698_v37, %v700_v38 }
  0x1c   : > { %s2538_s17 = scalar_select %p561_p11, %s2378_s21, 1  ;;  %v2033_v16 = vld [vmem:[%s2928_s4] ss:$0 sm:$0xff]  ;;  %v2603_v44 = vsub.s32 %v715_v39, %v700_v38 }
  0x1e   : > { %s2027_s24 = sshll.u32 %s2538_s17, 3  ;;  %s2069_s27 = sshll.u32 %s2538_s17, 4 }
  0x1f   : > { %s567_s29 = scalar_lea.vmem %s2926_s0, %s2027_s24  ;;  %s2584_s4 = scalar_lea.vmem %s2929_s1, %s2069_s27 }
  0x20   : > { %v2544_v0 = vld [vmem:[%s567_s29] sm:$0xff]  ;;  %s2393_s29 = smov 112   ;;  %v882_v30 = vld [vmem:[%s2584_s4 + $0x8] sm:$0xf]  ;;  %s2400_s0 = smov [#allocation6]  }
  0x21   : > { %v593_v1 = vsel %vm592_vm0, %v2544_v0, 0.0  ;;  %v880_v28 = vld [vmem:[%s2584_s4] sm:$0xf]  ;;  %v989_v31 = vsel %vm875_vm2, %v882_v30, 0  ;;  %v881_v38 = vld [vmem:[%s2584_s4 + $0x4] sm:$0xf] }
  0x22   : > { %594 = vadd.xlane.f32.xlu0 %v593_v1  ;;  %v897_v29 = vsel %vm875_vm2, %v880_v28, 0  ;;  %2126 = vmatpush3.bf16.xpose.msra.mxu1 %v989_v31  ;;  %v943_v39 = vsel %vm875_vm2, %v881_v38, 0  ;;  %s2312_s3 = sshll.u32 %s2400_s0, 4  ;;  %s2313_s3 = int_to_ptr.vmem [resolvable:$false] %s2312_s3 }
  0x23   : > { %2137 = vmatprep.subr.bf16.mxu1 %v2388_v8  ;;  %s2314_s1 = scalar_lea.vmem %s2313_s3, 256 }
  0xaf   : > { %v595_v2 = vpop.xlane.xlu0 %594 }
  0xb0   : > { %v597_v3 = vmul.f32 0.03125, %v595_v2 }
  0xb2   : > { %v598_v4 = vsub.f32 %v2544_v0, %v597_v3 }
  0xb4   : > { %v599_v5 = vmul.f32 %v598_v4, %v598_v4 }
  0xb6   : > { %v600_v6 = vsel %vm592_vm0, %v599_v5, 0.0 }
  0xb7   : > { %601 = vadd.xlane.f32.xlu0 %v600_v6 }
 0x144   : > { %v602_v10 = vpop.xlane.xlu0 %601 }
 0x145   : > { %v603_v11 = vmul.f32 0.03125, %v602_v10 }
 0x147   : > { %v604_v12 = vadd.f32 1e-05, %v603_v11 }
 0x149   : > { %2280 = vrsqrt.f32 %v604_v12 }
 0x153   : > { %v2281_v13 = vpop.eup %2280 }
 0x154   : > { %v606_v15 = vmul.f32 %v2281_v13, %v598_v4 }
 0x156   : > { %v613_v17 = vmul.f32 %v2032_v14, %v606_v15 }
 0x158   : > { %v620_v18 = vadd.f32 %v2033_v16, %v613_v17 }
 0x15a   : > { %v621_v19 = vpack.c.bf16 %v620_v18, %v620_v18 }
 0x15c   : > { %2110 = vmatmul.mubr.msk.bf16.vlgmr.msra.gmra.mrb[0].mxu0 %vm592_vm0, %v621_v19 }
 0x15d   : > { %2115 = vmatprep.mubr.msk.bf16.mxu0 %vm2389_vm1, %v2388_v8  ;;  %2114 = vmatpush3.bf16.xpose.msra.mxu0 %v897_v29 }
 0x15e   : > { %2119 = vmatprep.subr.bf16.mxu0 %v2388_v8 }
 0x22f   : > { %v682_v22 = vpop.f32.mrb[0].mxu0 }
 0x230   : > { %v683_v23 = vadd.f32 %v2034_v21, %v682_v22  ;;  %v2111_v24 = vpop.f32.mrb[1].mxu0 }
 0x231   : > { %v685_v25 = vpop.f32.mrb[2].mxu0 }
 0x232   : > { %v688_v26 = vpack.c.bf16 %v683_v23, %v683_v23  ;;  %v2112_v27 = vpop.f32.mrb[3].mxu0 }
 0x234   : > { %694 = vrot.lane.b32.xlu0 %v688_v26, %s2391_s22  ;;  %690 = vrot.lane.b32.xlu1 %v688_v26, %s2392_s25  ;;  %v702_v51 = vrot.slane %v688_v26, %v2600_v40  ;;  %s2397_s25 = smov 8  }
 0x238   : > { %692 = vrot.lane.b32.xlu1 %v688_v26, %s2393_s29  ;;  %s2398_s29 = smov 16  }
 0x2a6   : > { %v695_v41 = vpop.permute.xlu0 %694  ;;  %v691_v42 = vpop.permute.xlu1 %690 }
 0x2a7   : > { %v744_v43 = vrot.slane %v695_v41, %v2600_v40  ;;  %v736_v45 = vrot.slane %v691_v42, %v2600_v40 }
 0x2a9   : > { %v745_v46 = vcombine.low %v736_v45, %v744_v43  ;;  %v746_v47 = vcombine.high %v736_v45, %v744_v43  ;;  %v883_v43 = vld [vmem:[%s2584_s4 + $0xc] sm:$0xf]  ;;  %s583_s4 = scalar_lea.vmem %s2902_s2, %s2069_s27  ;;  %s2399_s27 = smov 24  }
 0x2aa   : > { %v693_v48 = vpop.permute.xlu1 %692  ;;  %v1035_v45 = vsel %vm875_vm2, %v883_v43, 0 }
 0x2ab   : > { %v753_v49 = vrot.slane %v745_v46, %v2603_v44  ;;  %v710_v50 = vrot.slane %v693_v48, %v2600_v40  ;;  %v760_v52 = vrot.slane %v746_v47, %v2603_v44  ;;  %v2396_v48 = vmov -inf  }
 0x2ac   : > { %867 = vst.msk [vmem:[#allocation3] sm:$0xff] %vm866_vm4, %v2396_v48  ;;  %868 = vst.msk [vmem:[#allocation3 + $0x8] sm:$0xff] %vm866_vm4, %v2396_v48 }
 0x2ad   : > { %v711_v53 = vcombine.low %v702_v51, %v710_v50  ;;  %v712_v54 = vcombine.high %v702_v51, %v710_v50  ;;  %v761_v55 = vcombine.high %v753_v49, %v2390_v20  ;;  %v762_v58 = vcombine.high %v760_v52, %v2390_v20  ;;  %869 = vst.msk [vmem:[#allocation3 + $0x10] sm:$0xff] %vm866_vm4, %v2396_v48 }
 0x2ae   : > { %v768_v59 = vshrl.u32 %v753_v49, 16  ;;  %v784_v2 = vshrl.u32 %v760_v52, 16  ;;  %870 = vst.msk [vmem:[#allocation3 + $0x18] sm:$0xff] %vm866_vm4, %v2396_v48 }
 0x2af   : > { %v719_v56 = vrot.slane %v711_v53, %v2603_v44  ;;  %v726_v57 = vrot.slane %v712_v54, %v2603_v44  ;;  %v776_v1 = vshrl.u32 %v761_v55, 16  ;;  %v792_v10 = vshrl.u32 %v762_v58, 16 }
 0x2b1   : > { %v727_v60 = vcombine.high %v719_v56, %v2390_v20  ;;  %v728_v61 = vcombine.high %v726_v57, %v2390_v20  ;;  %v765_v62 = vpack.i.b16 %v753_v49, %v719_v56  ;;  %v767_v63 = vshrl.u32 %v719_v56, 16 }
 0x2b2   : > { %v781_v3 = vpack.i.b16 %v760_v52, %v726_v57  ;;  %v783_v4 = vshrl.u32 %v726_v57, 16 }
 0x2b3   : > { %v769_v5 = vpack.i.b16 %v768_v59, %v767_v63  ;;  %v773_v6 = vpack.i.b16 %v761_v55, %v727_v60  ;;  %v775_v7 = vshrl.u32 %v727_v60, 16  ;;  %v789_v9 = vpack.i.b16 %v762_v58, %v728_v61 }
 0x2b4   : > { %v785_v11 = vpack.i.b16 %v784_v2, %v783_v4  ;;  %v791_v12 = vshrl.u32 %v728_v61, 16  ;;  %v795_v13 = vcombine.low %v765_v62, %v781_v3 }
 0x2b5   : > { %v777_v14 = vpack.i.b16 %v776_v1, %v775_v7  ;;  %v803_v15 = vcombine.low %v773_v6, %v789_v9  ;;  %v2667_v6 = vld [vmem:[#allocation3] sm:$0xff] }
 0x2b6   : > { %v793_v16 = vpack.i.b16 %v792_v10, %v791_v12  ;;  %v820_v17 = vcombine.low %v769_v5, %v785_v11  ;;  %v802_v18 = vrot.slane %v795_v13, %v2600_v40  ;;  %v2672_v10 = vld [vmem:[#allocation3 + $0x10] sm:$0xff] }
 0x2b7   : > { %v810_v19 = vrot.slane %v803_v15, %v2600_v40 }
 0x2b8   : > { %v828_v21 = vcombine.low %v777_v14, %v793_v16  ;;  %v827_v23 = vrot.slane %v820_v17, %v2600_v40  ;;  %v2682_v14 = vld [vmem:[#allocation3 + $0x8] sm:$0xff] }
 0x2b9   : > { %v811_v22 = vcombine.low %v802_v18, %v810_v19  ;;  %v2702_v19 = vld [vmem:[#allocation3 + $0x18] sm:$0xff] }
 0x2ba   : > { %v835_v24 = vrot.slane %v828_v21, %v2600_v40  ;;  %v884_v21 = vld [vmem:[%s583_s4] sm:$0xf] }
 0x2bb   : > { %v818_v25 = vrot.slane %v811_v22, %v2603_v44 }
 0x2bc   : > { %v836_v26 = vcombine.low %v827_v23, %v835_v24  ;;  %v1207_v23 = vsel %vm1205_vm5, %v884_v21, 0 }
 0x2bd   : > { %v819_v27 = vcombine.high %v818_v25, %v2390_v20  ;;  %v849_v31 = vshrl.u32 %v818_v25, 16 }
 0x2be   : > { %v843_v28 = vrot.slane %v836_v26, %v2603_v44  ;;  %v885_v26 = vld [vmem:[%s583_s4 + $0x4] sm:$0xf] }
 0x2bf   : > { %v857_v35 = vshrl.u32 %v819_v27, 16 }
 0x2c0   : > { %v844_v29 = vcombine.high %v843_v28, %v2390_v20  ;;  %v847_v30 = vpack.i.b16 %v843_v28, %v818_v25  ;;  %v850_v32 = vshrl.u32 %v843_v28, 16  ;;  %v1253_v28 = vsel %vm1205_vm5, %v885_v26, 0 }
 0x2c2   : > { %v851_v33 = vpack.i.b16 %v850_v32, %v849_v31  ;;  %v855_v34 = vpack.i.b16 %v844_v29, %v819_v27  ;;  %v858_v36 = vshrl.u32 %v844_v29, 16  ;;  %862 = vst.msk [vmem:[#allocation2] sm:$0xf] %vm861_vm3, %v847_v30  ;;  %v886_v27 = vld [vmem:[%s583_s4 + $0x8] sm:$0xf] }
 0x2c3   : > { %v1299_v29 = vsel %vm1205_vm5, %v886_v27, 0  ;;  %v887_v30 = vld [vmem:[%s583_s4 + $0xc] sm:$0xf]  ;;  %s2066_s4 = sshll.u32 %s2378_s21, 7 }
 0x2c4   : > { %v859_v37 = vpack.i.b16 %v858_v36, %v857_v35  ;;  %863 = vst.msk [vmem:[#allocation2 + $0x4] sm:$0xf] %vm861_vm3, %v851_v33  ;;  %864 = vst.msk [vmem:[#allocation2 + $0x8] sm:$0xf] %vm861_vm3, %v855_v34  ;;  %v1345_v31 = vsel %vm1205_vm5, %v887_v30, 0 }
 0x2c6   : > { %865 = vst.msk [vmem:[#allocation2 + $0xc] sm:$0xf] %vm861_vm3, %v859_v37 }
 0x2c9   : > { %v888_v41 = vld [vmem:[#allocation2] sm:$0xf] }
 0x2ca   : > { %2116 = vmatmul.mubr.msk.bf16.vlgmr.msra.gmra.mrb[4].mxu0 %vm875_vm2, %v888_v41 }
 0x2cb   : > { %2120 = vmatpush3.bf16.xpose.msra.mxu0 %v943_v39  ;;  %v890_v42 = vld [vmem:[#allocation2 + $0x8] sm:$0xf]  ;;  %2121 = vmatprep.mubr.msk.bf16.mxu0 %vm2389_vm1, %v2388_v8  ;;  %v889_v46 = vld [vmem:[#allocation2 + $0x4] sm:$0xf] }
 0x2cc   : > { %2128 = vmatmul.mubr.msk.bf16.vlgmr.msra.gmra.mrb[0].mxu1 %vm875_vm2, %v890_v42  ;;  %2131 = vmatprep.subr.bf16.mxu0 %v2388_v8 }
 0x2cd   : > { %2139 = vmatprep.mubr.msk.bf16.mxu1 %vm2389_vm1, %v2388_v8  ;;  %v891_v47 = vld [vmem:[#allocation2 + $0xc] sm:$0xf]  ;;  %2138 = vmatpush3.bf16.msra.mxu1 %v1207_v23 }
 0x2ce   : > { %2149 = vmatprep.subr.bf16.mxu1 %v2388_v8 }
 0x2d2   : > { %2122 = vmatmul.mubr.msk.bf16.vlgmr.msra.gmra.mrb[8].mxu0 %vm875_vm2, %v889_v46 }
 0x2d3   : > { %2132 = vmatpush3.bf16.xpose.msra.mxu0 %v1035_v45  ;;  %2133 = vmatprep.mubr.msk.bf16.mxu0 %vm2389_vm1, %v2388_v8 }
 0x2d4   : > { %2143 = vmatprep.subr.bf16.mxu0 %v2388_v8 }
 0x2da   : > { %2134 = vmatmul.mubr.msk.bf16.vlgmr.msra.gmra.mrb[12].mxu0 %vm875_vm2, %v891_v47 }
 0x2db   : > { %2145 = vmatprep.mubr.msk.bf16.mxu0 %vm2389_vm1, %v2388_v8  ;;  %2144 = vmatpush3.bf16.msra.mxu0 %v1253_v28 }
 0x2dc   : > { %2155 = vmatprep.subr.bf16.mxu0 %v2388_v8 }
 0x39d   : > { %v2654_v49 = vpop.f32.mrb[4].mxu0 }
 0x39e   : > { %v2117_v50 = vpop.f32.mrb[5].mxu0  ;;  %v1081_v51 = vsel %vm875_vm2, %v2654_v49, -inf }
 0x39f   : > { %v2658_v52 = vpop.f32.mrb[0].mxu1  ;;  %1082 = vmax.xlane.f32.xlu1 %v1081_v51  ;;  %v936_v53 = vpop.f32.mrb[6].mxu0 }
 0x3a0   : > { %v2118_v54 = vpop.f32.mrb[7].mxu0  ;;  %v2129_v55 = vpop.f32.mrb[1].mxu1  ;;  %v1087_v58 = vsel %vm875_vm2, %v2658_v52, -inf }
 0x3a1   : > { %v1028_v56 = vpop.f32.mrb[2].mxu1 }
 0x3a2   : > { %v2130_v57 = vpop.f32.mrb[3].mxu1 }
 0x3a3   : > { %1088 = vmax.xlane.f32.xlu1 %v1087_v58 }
 0x3a5   : > { %v979_v59 = vpop.f32.mrb[8].mxu0 }
 0x3a6   : > { %v2123_v60 = vpop.f32.mrb[9].mxu0  ;;  %v1084_v61 = vsel %vm875_vm2, %v979_v59, -inf }
 0x3a7   : > { %1085 = vmax.xlane.f32.xlu0 %v1084_v61  ;;  %v982_v62 = vpop.f32.mrb[10].mxu0 }
 0x3a8   : > { %v2124_v63 = vpop.f32.mrb[11].mxu0 }
 0x3ad   : > { %v2663_v1 = vpop.f32.mrb[12].mxu0 }
 0x3ae   : > { %v2135_v2 = vpop.f32.mrb[13].mxu0  ;;  %v1090_v3 = vsel %vm875_vm2, %v2663_v1, -inf }
 0x3af   : > { %1091 = vmax.xlane.f32.xlu1 %v1090_v3  ;;  %v1074_v4 = vpop.f32.mrb[14].mxu0  ;;  %v1141_v3 = vld [vmem:[#allocation4] sm:$0xff] }
 0x3b0   : > { %v2136_v5 = vpop.f32.mrb[15].mxu0 }
 0x42c   : > { %v1083_v7 = vpop.xlane.xlu1 %1082 }
 0x42d   : > { %v2670_v9 = vmax.f32 %v2667_v6, %v1083_v7 }
 0x42f   : > { %v1097_v11 = vsub.f32 %v2667_v6, %v2670_v9  ;;  %1395 = vst.msk [vmem:[#allocation3] sm:$0xff] %vm866_vm4, %v2670_v9  ;;  %1111 = vperm.xlu1 %2264, %v2670_v9   ;;  %v1143_v6 = vld [vmem:[#allocation4 + $0x10] sm:$0xff] }
 0x430   : > { %v1089_v12 = vpop.xlane.xlu1 %1088 }
 0x431   : > { %v2680_v13 = vmax.f32 %v2672_v10, %v1089_v12 }
 0x433   : > { %v1099_v15 = vsub.f32 %v2672_v10, %v2680_v13  ;;  %1397 = vst.msk [vmem:[#allocation3 + $0x10] sm:$0xff] %vm866_vm4, %v2680_v13  ;;  %1121 = vperm.xlu1 %2264, %v2680_v13  }
 0x434   : > { %v1086_v16 = vpop.xlane.xlu0 %1085 }
 0x435   : > { %v2690_v17 = vmax.f32 %v2682_v14, %v1086_v16  ;;  %v1105_v60 = vmul.f32 1.442695, %v1099_v15 }
 0x437   : > { %v1098_v18 = vsub.f32 %v2682_v14, %v2690_v17  ;;  %1396 = vst.msk [vmem:[#allocation3 + $0x8] sm:$0xff] %vm866_vm4, %v2690_v17  ;;  %1116 = vperm.xlu0 %2265, %v2690_v17   ;;  %v1144_v17 = vld [vmem:[#allocation4 + $0x18] sm:$0xff] }
 0x439   : > { %v1103_v56 = vmul.f32 1.442695, %v1098_v18 }
 0x43c   : > { %v1092_v22 = vpop.xlane.xlu1 %1091 }
 0x43d   : > { %v2706_v24 = vmax.f32 %v2702_v19, %v1092_v22 }
 0x43f   : > { %v1100_v25 = vsub.f32 %v2702_v19, %v2706_v24  ;;  %1398 = vst.msk [vmem:[#allocation3 + $0x18] sm:$0xff] %vm866_vm4, %v2706_v24  ;;  %1126 = vperm.xlu1 %2264, %v2706_v24  }
 0x441   : > { %v1107_v61 = vmul.f32 1.442695, %v1100_v25 }
 0x4ae   : > { %v1112_v32 = vpop.permute.xlu1 %1111 }
 0x4af   : > { %v1129_v33 = vsub.f32 %v2654_v49, %v1112_v32 }
 0x4b1   : > { %v1133_v34 = vmul.f32 1.442695, %v1129_v33 }
 0x4b2   : > { %v1122_v35 = vpop.permute.xlu1 %1121 }
 0x4b3   : > { %2282 = vpow2.f32 %v1133_v34  ;;  %v1131_v36 = vsub.f32 %v2658_v52, %v1122_v35  ;;  %v2268_v35 = vld [vmem:[%s2907_s7] sm:$0xff]  }
 0x4b5   : > { %v1137_v37 = vmul.f32 1.442695, %v1131_v36 }
 0x4b6   : > { %v1117_v38 = vpop.permute.xlu0 %1116 }
 0x4b7   : > { %2284 = vpow2.f32 %v1137_v37  ;;  %v1130_v39 = vsub.f32 %v979_v59, %v1117_v38  ;;  %v1101_v59 = vmul.f32 1.442695, %v1097_v11  ;;  %v1142_v11 = vld [vmem:[#allocation4 + $0x8] sm:$0xff] }
 0x4b8   : > { %v1171_v38 = vld [vmem:[#allocation5 + $0x8] sm:$0xff] }
 0x4b9   : > { %v1135_v41 = vmul.f32 1.442695, %v1130_v39 }
 0x4bb   : > { %2286 = vpow2.f32 %v1135_v41  ;;  %v1172_v41 = vld [vmem:[#allocation5 + $0x10] sm:$0xff] }
 0x4bd   : > { %v2283_v42 = vpop.eup %2282 }
 0x4be   : > { %v1127_v43 = vpop.permute.xlu1 %1126  ;;  %v1149_v45 = vsel %vm875_vm2, %v2283_v42, 0.0  ;;  %v1198_v46 = vpack.c.bf16 %v2283_v42, %v2283_v42 }
 0x4bf   : > { %v1132_v47 = vsub.f32 %v2663_v1, %v1127_v43  ;;  %1150 = vadd.xlane.f32.xlu1 %v1149_v45 }
 0x4c0   : > { %2140 = vmatmul.mubr.msk.bf16.vlgmr.msra.gmra.mrb[4].mxu1 %vm875_vm2, %v1198_v46 }
 0x4c1   : > { %v2285_v48 = vpop.eup %2284  ;;  %v1139_v49 = vmul.f32 1.442695, %v1132_v47  ;;  %2150 = vmatpush3.bf16.msra.mxu1 %v1299_v29  ;;  %2151 = vmatprep.mubr.msk.bf16.mxu1 %vm2389_vm1, %v2388_v8  ;;  %v1170_v29 = vld [vmem:[#allocation5] sm:$0xff] }
 0x4c2   : > { %v1155_v50 = vsel %vm875_vm2, %v2285_v48, 0.0  ;;  %2161 = vmatprep.subr.bf16.mxu1 %v2388_v8  ;;  %v1200_v54 = vpack.c.bf16 %v2285_v48, %v2285_v48 }
 0x4c3   : > { %2288 = vpow2.f32 %v1139_v49  ;;  %1156 = vadd.xlane.f32.xlu1 %v1155_v50 }
 0x4c4   : > { %2290 = vpow2.f32 %v1103_v56  ;;  %v1173_v56 = vld [vmem:[#allocation5 + $0x18] sm:$0xff] }
 0x4c5   : > { %v2287_v51 = vpop.eup %2286  ;;  %2292 = vpow2.f32 %v1101_v59 }
 0x4c6   : > { %v1152_v52 = vsel %vm875_vm2, %v2287_v51, 0.0  ;;  %v1199_v53 = vpack.c.bf16 %v2287_v51, %v2287_v51  ;;  %2294 = vpow2.f32 %v1105_v60 }
 0x4c7   : > { %1153 = vadd.xlane.f32.xlu0 %v1152_v52  ;;  %2296 = vpow2.f32 %v1107_v61 }
 0x4c8   : > { %2146 = vmatmul.mubr.msk.bf16.vlgmr.msra.gmra.mrb[16].mxu0 %vm875_vm2, %v1199_v53  ;;  %2152 = vmatmul.mubr.msk.bf16.vlgmr.msra.gmra.mrb[8].mxu1 %vm875_vm2, %v1200_v54 }
 0x4c9   : > { %2156 = vmatpush3.bf16.msra.mxu0 %v1345_v31  ;;  %2157 = vmatprep.mubr.msk.bf16.mxu0 %vm2389_vm1, %v2388_v8 }
 0x4ca   : > { %2165 = vmatprep.mubr.msk.bf16.mxu1 %vm2389_vm1, %v2388_v8  ;;  %2169 = vmatprep.subr.bf16.mxu0 %v2388_v8 }
 0x4cb   : > { %2162 = vmatpush3.bf16.msra.mxu1 %v2268_v35 }
 0x4cc   : > { %2163 = vmatprep.subr.bf16.mxu1 %v2388_v8 }
 0x4cd   : > { %v2289_v55 = vpop.eup %2288 }
 0x4ce   : > { %v1158_v57 = vsel %vm875_vm2, %v2289_v55, 0.0  ;;  %v1201_v58 = vpack.c.bf16 %v2289_v55, %v2289_v55  ;;  %v2291_v62 = vpop.eup %2290 }
 0x4cf   : > { %1159 = vadd.xlane.f32.xlu1 %v1158_v57  ;;  %v2293_v63 = vpop.eup %2292  ;;  %v1146_v13 = vmul.f32 %v2291_v62, %v1142_v11 }
 0x4d0   : > { %2158 = vmatmul.mubr.msk.bf16.vlgmr.msra.gmra.mrb[20].mxu0 %vm875_vm2, %v1201_v58  ;;  %v2295_v1 = vpop.eup %2294  ;;  %v1145_v4 = vmul.f32 %v2293_v63, %v1141_v3 }
 0x4d1   : > { %2173 = vmatprep.mubr.msk.bf16.mxu0 %vm2389_vm1, %v2388_v8  ;;  %v2297_v2 = vpop.eup %2296  ;;  %v1147_v9 = vmul.f32 %v2295_v1, %v1143_v6 }
 0x4d2   : > { %v1148_v18 = vmul.f32 %v2297_v2, %v1144_v17 }
 0x4dd   : > { %1181 = vperm.xlu0 %2265, %v2291_v62  }
 0x4e0   : > { %1176 = vperm.xlu1 %2264, %v2293_v63  }
 0x4e4   : > { %1186 = vperm.xlu1 %2264, %v2295_v1  }
 0x4e8   : > { %1191 = vperm.xlu1 %2264, %v2297_v2  }
 0x54c   : > { %v1151_v5 = vpop.xlane.xlu1 %1150 }
 0x54d   : > { %v1161_v7 = vadd.f32 %v1151_v5, %v1145_v4 }
 0x54f   : > { %1166 = vst.msk [vmem:[#allocation4] sm:$0xff] %vm866_vm4, %v1161_v7 }
 0x550   : > { %v1157_v10 = vpop.xlane.xlu1 %1156 }
 0x551   : > { %v1163_v12 = vadd.f32 %v1157_v10, %v1147_v9 }
 0x553   : > { %1168 = vst.msk [vmem:[#allocation4 + $0x10] sm:$0xff] %vm866_vm4, %v1163_v12 }
 0x554   : > { %v1154_v14 = vpop.xlane.xlu0 %1153 }
 0x555   : > { %v1162_v15 = vadd.f32 %v1154_v14, %v1146_v13 }
 0x556   : > { %v1406_v16 = vld [vmem:[#allocation4] sm:$0xff] }
 0x557   : > { %1167 = vst.msk [vmem:[#allocation4 + $0x8] sm:$0xff] %vm866_vm4, %v1162_v15  ;;  %2298 = vrcp.f32 %v1406_v16 }
 0x55a   : > { %v1408_v23 = vld [vmem:[#allocation4 + $0x10] sm:$0xff] }
 0x55c   : > { %v1160_v19 = vpop.xlane.xlu1 %1159  ;;  %v1182_v39 = vpop.permute.xlu0 %1181 }
 0x55d   : > { %v1164_v21 = vadd.f32 %v1160_v19, %v1148_v18  ;;  %v1195_v43 = vmul.f32 %v1182_v39, %v1171_v38 }
 0x55e   : > { %v1407_v22 = vld [vmem:[#allocation4 + $0x8] sm:$0xff] }
 0x55f   : > { %1169 = vst.msk [vmem:[#allocation4 + $0x18] sm:$0xff] %vm866_vm4, %v1164_v21  ;;  %2300 = vrcp.f32 %v1407_v22 }
 0x560   : > { %2302 = vrcp.f32 %v1408_v23  ;;  %v1177_v30 = vpop.permute.xlu1 %1176 }
 0x561   : > { %v2299_v24 = vpop.eup %2298  ;;  %v1194_v31 = vmul.f32 %v1177_v30, %v1170_v29 }
 0x562   : > { %1416 = vperm.xlu1 %2264, %v2299_v24  }
 0x564   : > { %v1187_v42 = vpop.permute.xlu1 %1186 }
 0x565   : > { %v1196_v45 = vmul.f32 %v1187_v42, %v1172_v41 }
 0x566   : > { %v1409_v25 = vld [vmem:[#allocation4 + $0x18] sm:$0xff] }
 0x567   : > { %2304 = vrcp.f32 %v1409_v25 }
 0x568   : > { %v1192_v57 = vpop.permute.xlu1 %1191 }
 0x569   : > { %v2301_v26 = vpop.eup %2300  ;;  %v1197_v58 = vmul.f32 %v1192_v57, %v1173_v56 }
 0x56a   : > { %1421 = vperm.xlu1 %2264, %v2301_v26   ;;  %v2303_v27 = vpop.eup %2302 }
 0x56e   : > { %1426 = vperm.xlu1 %2264, %v2303_v27  }
 0x571   : > { %v2305_v28 = vpop.eup %2304 }
 0x572   : > { %1431 = vperm.xlu0 %2265, %v2305_v28  }
 0x593   : > { %v1243_v32 = vpop.f32.mrb[4].mxu1 }
 0x594   : > { %v1387_v33 = vadd.f32 %v1243_v32, %v1194_v31  ;;  %v2141_v34 = vpop.f32.mrb[5].mxu1 }
 0x595   : > { %v1246_v36 = vpop.f32.mrb[6].mxu1 }
 0x596   : > { %1391 = vst.msk [vmem:[#allocation5] sm:$0xff] %vm875_vm2, %v1387_v33  ;;  %v2142_v37 = vpop.f32.mrb[7].mxu1 }
 0x59b   : > { %v1289_v46 = vpop.f32.mrb[16].mxu0  ;;  %v1335_v47 = vpop.f32.mrb[8].mxu1 }
 0x59c   : > { %v1388_v48 = vadd.f32 %v1289_v46, %v1195_v43  ;;  %v1389_v49 = vadd.f32 %v1335_v47, %v1196_v45  ;;  %v2147_v50 = vpop.f32.mrb[17].mxu0  ;;  %v2153_v51 = vpop.f32.mrb[9].mxu1 }
 0x59d   : > { %v1292_v52 = vpop.f32.mrb[18].mxu0  ;;  %v1338_v53 = vpop.f32.mrb[10].mxu1  ;;  %v1402_v2 = vld [vmem:[#allocation5] sm:$0xff] }
 0x59e   : > { %1392 = vst.msk [vmem:[#allocation5 + $0x8] sm:$0xff] %vm875_vm2, %v1388_v48  ;;  %1393 = vst.msk [vmem:[#allocation5 + $0x10] sm:$0xff] %vm875_vm2, %v1389_v49  ;;  %v2148_v54 = vpop.f32.mrb[19].mxu0  ;;  %v2154_v55 = vpop.f32.mrb[11].mxu1 }
 0x5a3   : > { %v1381_v59 = vpop.f32.mrb[20].mxu0 }
 0x5a4   : > { %v1390_v60 = vadd.f32 %v1381_v59, %v1197_v58  ;;  %v2159_v61 = vpop.f32.mrb[21].mxu0  ;;  %v2269_v58 = vld [vmem:[%s2907_s7 + $0x8] sm:$0xff]  }
 0x5a5   : > { %v1384_v62 = vpop.f32.mrb[22].mxu0  ;;  %v1404_v5 = vld [vmem:[#allocation5 + $0x10] sm:$0xff]  ;;  %v1403_v9 = vld [vmem:[#allocation5 + $0x8] sm:$0xff]  ;;  %2164 = vmatpush3.bf16.msra.mxu1 %v2269_v58 }
 0x5a6   : > { %1394 = vst.msk [vmem:[#allocation5 + $0x18] sm:$0xff] %vm875_vm2, %v1390_v60  ;;  %v2160_v63 = vpop.f32.mrb[23].mxu0  ;;  %2177 = vmatprep.subr.bf16.mxu1 %v2388_v8 }
 0x5ad   : > { %v1405_v14 = vld [vmem:[#allocation5 + $0x18] sm:$0xff] }
 0x5e1   : > { %v1417_v1 = vpop.permute.xlu1 %1416 }
 0x5e2   : > { %v1434_v4 = vmul.f32 %v1417_v1, %v1402_v2 }
 0x5e4   : > { %v1438_v7 = vpack.c.bf16 %v1434_v4, %v1434_v4 }
 0x5e6   : > { %v1445_v15 = vrot.slane %v1438_v7, %v2600_v40 }
 0x5e9   : > { %v1422_v3 = vpop.permute.xlu1 %1421 }
 0x5ea   : > { %v1435_v11 = vmul.f32 %v1422_v3, %v1403_v9 }
 0x5ec   : > { %v1472_v18 = vpack.c.bf16 %v1435_v11, %v1435_v11 }
 0x5ed   : > { %v1427_v6 = vpop.permute.xlu1 %1426 }
 0x5ee   : > { %v1436_v10 = vmul.f32 %v1427_v6, %v1404_v5  ;;  %v1479_v25 = vrot.slane %v1472_v18, %v2600_v40 }
 0x5f0   : > { %v1446_v12 = vpack.c.bf16 %v1436_v10, %v1436_v10 }
 0x5f1   : > { %v1432_v13 = vpop.permute.xlu0 %1431 }
 0x5f2   : > { %v1453_v16 = vrot.slane %v1446_v12, %v2600_v40  ;;  %v1437_v17 = vmul.f32 %v1432_v13, %v1405_v14 }
 0x5f4   : > { %v1454_v19 = vcombine.low %v1445_v15, %v1453_v16  ;;  %v1455_v21 = vcombine.high %v1445_v15, %v1453_v16  ;;  %v1480_v22 = vpack.c.bf16 %v1437_v17, %v1437_v17  ;;  %v2046_v17 = vld [vmem:[%s2908_s8] ss:$0 sm:$0xff] }
 0x5f6   : > { %v1462_v23 = vrot.slane %v1454_v19, %v2603_v44  ;;  %v1487_v24 = vrot.slane %v1480_v22, %v2600_v40  ;;  %v1469_v26 = vrot.slane %v1455_v21, %v2603_v44 }
 0x5f8   : > { %v1488_v27 = vcombine.low %v1479_v25, %v1487_v24  ;;  %v1489_v28 = vcombine.high %v1479_v25, %v1487_v24  ;;  %v1470_v29 = vcombine.high %v1462_v23, %v2390_v20  ;;  %v1471_v32 = vcombine.high %v1469_v26, %v2390_v20 }
 0x5f9   : > { %v1510_v33 = vshrl.u32 %v1462_v23, 16  ;;  %v1526_v39 = vshrl.u32 %v1469_v26, 16 }
 0x5fa   : > { %v1496_v30 = vrot.slane %v1488_v27, %v2603_v44  ;;  %v1503_v31 = vrot.slane %v1489_v28, %v2603_v44  ;;  %v1518_v38 = vshrl.u32 %v1470_v29, 16  ;;  %v1534_v48 = vshrl.u32 %v1471_v32, 16 }
 0x5fc   : > { %v1504_v34 = vcombine.high %v1496_v30, %v2390_v20  ;;  %v1505_v35 = vcombine.high %v1503_v31, %v2390_v20  ;;  %v1508_v36 = vpack.i.b16 %v1496_v30, %v1462_v23  ;;  %v1511_v37 = vshrl.u32 %v1496_v30, 16 }
 0x5fd   : > { %v1524_v41 = vpack.i.b16 %v1503_v31, %v1469_v26  ;;  %v1527_v42 = vshrl.u32 %v1503_v31, 16  ;;  %v2270_v31 = vld [vmem:[%s2911_s11] sm:$0xff]  }
 0x5fe   : > { %v1512_v43 = vpack.i.b16 %v1511_v37, %v1510_v33  ;;  %v1516_v45 = vpack.i.b16 %v1504_v34, %v1470_v29  ;;  %v1519_v46 = vshrl.u32 %v1504_v34, 16  ;;  %v1532_v47 = vpack.i.b16 %v1505_v35, %v1471_v32  ;;  %2170 = vmatpush3.bf16.msra.mxu0 %v2270_v31  ;;  %v2272_v32 = vld [vmem:[%s2913_s13] sm:$0xff]   ;;  %v2273_v33 = vld [vmem:[%s2913_s13 + $0x8] sm:$0xff]   ;;  %v2274_v34 = vld [vmem:[%s2913_s13 + $0x10] sm:$0xff]  }
 0x5ff   : > { %v1528_v49 = vpack.i.b16 %v1527_v42, %v1526_v39  ;;  %v1535_v50 = vshrl.u32 %v1505_v35, 16  ;;  %v1538_v51 = vcombine.low %v1508_v36, %v1524_v41  ;;  %2171 = vmatprep.subr.bf16.mxu0 %v2388_v8  ;;  %v2275_v35 = vld [vmem:[%s2913_s13 + $0x18] sm:$0xff]   ;;  %v2276_v36 = vld [vmem:[%s2913_s13 + $0x20] sm:$0xff]   ;;  %v2277_v37 = vld [vmem:[%s2913_s13 + $0x28] sm:$0xff]  }
 0x600   : > { %v1520_v52 = vpack.i.b16 %v1519_v46, %v1518_v38  ;;  %v1546_v53 = vcombine.low %v1516_v45, %v1532_v47  ;;  %v2051_v46 = vld [vmem:[%s2910_s10] ss:$0 sm:$0xff] }
 0x601   : > { %v1536_v54 = vpack.i.b16 %v1535_v50, %v1534_v48  ;;  %v1563_v55 = vcombine.low %v1512_v43, %v1528_v49  ;;  %v1545_v56 = vrot.slane %v1538_v51, %v2600_v40  ;;  %v2050_v43 = vld [vmem:[%s2909_s9] ss:$0 sm:$0xff]  ;;  %v2278_v50 = vld [vmem:[%s2913_s13 + $0x30] sm:$0xff]   ;;  %v2279_v51 = vld [vmem:[%s2913_s13 + $0x38] sm:$0xff]  }
 0x602   : > { %v1553_v57 = vrot.slane %v1546_v53, %v2600_v40 }
 0x603   : > { %v1571_v59 = vcombine.low %v1520_v52, %v1536_v54  ;;  %v1570_v61 = vrot.slane %v1563_v55, %v2600_v40  ;;  %v2052_v52 = vld [vmem:[%s2912_s12] ss:$0 sm:$0xff] }
 0x604   : > { %v1554_v60 = vcombine.low %v1545_v56, %v1553_v57 }
 0x605   : > { %v1578_v62 = vrot.slane %v1571_v59, %v2600_v40 }
 0x606   : > { %v1561_v63 = vrot.slane %v1554_v60, %v2603_v44  ;;  %v2064_v60 = vld [vmem:[%s2914_s14] ss:$0 sm:$0xff] }
 0x607   : > { %v1579_v1 = vcombine.low %v1570_v61, %v1578_v62 }
 0x608   : > { %v1591_v3 = vshrl.u32 %v1561_v63, 16  ;;  %v1562_v5 = vcombine.high %v1561_v63, %v2390_v20 }
 0x609   : > { %v1586_v2 = vrot.slane %v1579_v1, %v2603_v44 }
 0x60a   : > { %v1597_v40 = vshrl.u32 %v1562_v5, 16 }
 0x60b   : > { %v1592_v4 = vshrl.u32 %v1586_v2, 16  ;;  %v1587_v6 = vcombine.high %v1586_v2, %v2390_v20  ;;  %v1590_v7 = vpack.i.b16 %v1586_v2, %v1561_v63 }
 0x60d   : > { %v1593_v9 = vpack.i.b16 %v1592_v4, %v1591_v3  ;;  %v1596_v10 = vpack.i.b16 %v1587_v6, %v1562_v5  ;;  %v1598_v11 = vshrl.u32 %v1587_v6, 16 }
 0x60f   : > { %1600 = vrot.lane.b32.xlu1 %v1593_v9, %s2397_s25  ;;  %1602 = vrot.lane.b32.xlu0 %v1596_v10, %s2398_s29  ;;  %v1599_v12 = vpack.i.b16 %v1598_v11, %v1597_v40  ;;  %s558_s29 = sand.u32 1, %s2370_s19   ;;  %s2852_s25 = scalar_lea.hbm %s2915_s15, %s2066_s4 }
 0x610   : > { %s1897_s21 = scalar_lea.sflag [#allocation7], %s558_s29 }
 0x613   : > { %1604 = vrot.lane.b32.xlu1 %v1599_v12, %s2399_s27  ;;  %s2026_s27 = sshll.u32 %s558_s29, 3 }
 0x614   : > { %s560_s17 = scalar_lea.vmem [#allocation6], %s2026_s27 }
 0x615   : > { %s1911_s26 = sshll.u32 %s560_s17, 4  ;;  %s2854_s26 = int_to_ptr.vmem [resolvable:$true] %s1911_s26 }
 0x616   : > { %s2308_s27 = scalar_lea.vmem %s2854_s26, 128  ;;  %p2315_p1 = scmp.lt.s32.totalorder %s2854_s26, %s2313_s3 }
 0x617   : > { %p2309_p12 = scmp.ne.s32.totalorder %s2854_s26, %s2308_s27  ;;  %p2316_p2 = scmp.lt.s32.totalorder %s2314_s1, %s2308_s27 }
 0x619   : > { %p2310_p13 = pnand %p2309_p12, %p2521_p4  ;;  %p2317_p3 = por %p2316_p2, %p2315_p1 }
 0x61b   : > { %p2311_p0 = pneg %p2310_p13 }
 0x61d   : > { %p2318_p5 = pnand %p2317_p3, %p2311_p0 }
 0x681   : > { %v1601_v13 = vpop.permute.xlu1 %1600  ;;  %v1603_v14 = vpop.permute.xlu0 %1602 }
 0x682   : > { %v1608_v44 = vsel %vm875_vm2, %v1590_v7, %v1601_v13 }
 0x683   : > { %v1611_v15 = vsel %vm1609_vm6, %v1608_v44, %v1603_v14 }
 0x685   : > { %v1605_v20 = vpop.permute.xlu1 %1604 }
 0x686   : > { %v1614_v16 = vsel %vm1612_vm7, %v1611_v15, %v1605_v20 }
 0x687   : > { %2166 = vmatmul.mubr.msk.bf16.vlgmr.msra.gmra.mrb[12].mxu1 %vm592_vm0, %v1614_v16 }
 0x688   : > { %2193 = vmatprep.mubr.msk.bf16.mxu1 %vm2389_vm1, %v2388_v8  ;;  %2178 = vmatpush3.bf16.msra.mxu1 %v2272_v32 }
 0x689   : > { %2179 = vmatprep.subr.bf16.mxu1 %v2388_v8 }
 0x68c   : > { %2180 = vmatpush3.bf16.msra.mxu1 %v2273_v33 }
 0x68d   : > { %2181 = vmatprep.subr.bf16.mxu1 %v2388_v8 }
 0x690   : > { %2182 = vmatpush3.bf16.msra.mxu1 %v2274_v34 }
 0x691   : > { %2183 = vmatprep.subr.bf16.mxu1 %v2388_v8 }
 0x694   : > { %2184 = vmatpush3.bf16.msra.mxu1 %v2275_v35 }
 0x695   : > { %2185 = vmatprep.subr.bf16.mxu1 %v2388_v8 }
 0x698   : > { %2186 = vmatpush3.bf16.msra.mxu1 %v2276_v36 }
 0x699   : > { %2187 = vmatprep.subr.bf16.mxu1 %v2388_v8 }
 0x69c   : > { %2188 = vmatpush3.bf16.msra.mxu1 %v2277_v37 }
 0x69d   : > { %2189 = vmatprep.subr.bf16.mxu1 %v2388_v8 }
 0x6a0   : > { %2190 = vmatpush3.bf16.msra.mxu1 %v2278_v50 }
 0x6a1   : > { %2191 = vmatprep.subr.bf16.mxu1 %v2388_v8 }
 0x6a4   : > { %2192 = vmatpush3.bf16.msra.mxu1 %v2279_v51 }
 0x75a   : > { %v1675_v18 = vpop.f32.mrb[12].mxu1 }
 0x75b   : > { %v1676_v19 = vadd.f32 %v2046_v17, %v1675_v18  ;;  %v2167_v21 = vpop.f32.mrb[13].mxu1 }
 0x75c   : > { %v1678_v22 = vpop.f32.mrb[14].mxu1 }
 0x75d   : > { %v2789_v23 = vadd.f32 %v1676_v19, %v2544_v0  ;;  %v2168_v24 = vpop.f32.mrb[15].mxu1  ;;  %v2271_v0 = vld [vmem:[%s2911_s11 + $0x8] sm:$0xff]  }
 0x75e   : > { %2172 = vmatpush3.bf16.msra.mxu0 %v2271_v0 }
 0x75f   : > { %v1685_v25 = vsel %vm592_vm0, %v2789_v23, 0.0 }
 0x760   : > { %1686 = vadd.xlane.f32.xlu0 %v1685_v25 }
 0x7ed   : > { %v1687_v26 = vpop.xlane.xlu0 %1686 }
 0x7ee   : > { %v1689_v27 = vmul.f32 0.03125, %v1687_v26 }
 0x7f0   : > { %v1690_v28 = vsub.f32 %v2789_v23, %v1689_v27 }
 0x7f2   : > { %v1691_v29 = vmul.f32 %v1690_v28, %v1690_v28 }
 0x7f4   : > { %v1692_v30 = vsel %vm592_vm0, %v1691_v29, 0.0 }
 0x7f5   : > { %1693 = vadd.xlane.f32.xlu1 %v1692_v30 }
 0x882   : > { %v1694_v38 = vpop.xlane.xlu1 %1693 }
 0x883   : > { %v1695_v39 = vmul.f32 0.03125, %v1694_v38 }
 0x885   : > { %v1696_v41 = vadd.f32 1e-05, %v1695_v39 }
 0x887   : > { %2306 = vrsqrt.f32 %v1696_v41 }
 0x891   : > { %v2307_v42 = vpop.eup %2306 }
 0x892   : > { %v1698_v45 = vmul.f32 %v2307_v42, %v1690_v28 }
 0x894   : > { %v1705_v47 = vmul.f32 %v2050_v43, %v1698_v45 }
 0x896   : > { %v1712_v48 = vadd.f32 %v2051_v46, %v1705_v47 }
 0x898   : > { %v1713_v49 = vpack.c.bf16 %v1712_v48, %v1712_v48 }
 0x89a   : > { %2174 = vmatmul.mubr.msk.bf16.vlgmr.msra.gmra.mrb[24].mxu0 %vm592_vm0, %v1713_v49 }
 0x96d   : > { %v1774_v53 = vpop.f32.mrb[24].mxu0 }
 0x96e   : > { %v1775_v54 = vadd.f32 %v2052_v52, %v1774_v53  ;;  %v2175_v55 = vpop.f32.mrb[25].mxu0 }
 0x96f   : > { %v1777_v56 = vpop.f32.mrb[26].mxu0 }
 0x970   : > { %v1780_v57 = vmax.f32 %v1775_v54, 0.0  ;;  %v2176_v58 = vpop.f32.mrb[27].mxu0 }
 0x972   : > { %v1781_v59 = vpack.c.bf16 %v1780_v57, %v1780_v57 }
 0x974   : > { %2194 = vmatmul.mubr.bf16.vlgmr.msra.gmra.mrb[16].mxu1 %v1781_v59 }
 0xa47   : > { %v1880_v8 = vpop.f32.mrb[16].mxu1 }
 0xa48   : > { %v1886_v61 = vadd.f32 %v1880_v8, %v2789_v23  ;;  %v2195_v62 = vpop.f32.mrb[17].mxu1 }
 0xa49   : > { %v1883_v63 = vpop.f32.mrb[18].mxu1 }
 0xa4a   : > { %v1894_v1 = vadd.f32 %v2064_v60, %v1886_v61  ;;  %v2196_v2 = vpop.f32.mrb[19].mxu1 }
 0xa4c   : > { %1895 = vst.msk [vmem:[%s560_s17] sm:$0xff] %vm592_vm0, %v1894_v1 }
 0xa4d   : > { %2321 = shalt.err (!%p2318_p5)
}
 0xa4e   : > { %s2322_s29 = scalar_lea.hbm %s2852_s25, 128  ;;  %s2326_s24 = scalar_lea.hbm %s2915_s15, 256 }
 0xa4f   : > { %p2323_p6 = scmp.ne.s32.totalorder %s2852_s25, %s2322_s29  ;;  %p2327_p10 = scmp.lt.u32.totalorder %s2852_s25, %s2915_s15 }
 0xa50   : > { %p2328_p11 = scmp.lt.u32.totalorder %s2326_s24, %s2322_s29  ;;  %p2330_p13 = scmp.lt.u32.totalorder %s2322_s29, %s2852_s25 }
 0xa51   : > { %p2324_p7 = pnand %p2323_p6, %p2521_p4 }
 0xa52   : > { %p2329_p12 = por %p2328_p11, %p2327_p10 }
 0xa53   : > { %p2325_p9 = pneg %p2324_p7 }
 0xa54   : > { %p2331_p0 = por %p2330_p13, %p2329_p12 }
 0xa56   : > { %p2332_p1 = pnand %p2331_p0, %p2325_p9 }
 0xa58   : > { %2335 = shalt.err (!%p2332_p1)
}
 0xa59   : > { %2197 = dma.vmem_to_hbm [thread:$0]  (%p2521_p4), %s2854_s26, 128, %s2852_s25, %s1897_s21  }
 0xa5a PF: > { %p2203_p2 = scmp.ge.s32.totalorder %s2386_s23, 2  ;;  %s1923_s1 = sand.u32 1, %s2366_s18  }
 0xa5b   : > { %s1924_s27 = scalar_lea.sflag [#allocation7], %s1923_s1 }
 0xa5c   : > { %p2200_p3 = pnand %p2203_p2, %p2528_p8 }
 0xa5e   : > { %2361 = dma.done.wait (!%p2200_p3), %s1924_s27, 128  }
 0xa5f   : > { %2363 = vsyncadd (!%p2200_p3), %s1924_s27, 4294967168  ;;  %s28_s23 = sadd.s32 1, %s2386_s23   ;;  %s2930_s21 = sld [smem:[#allocation9_spill]] }
 0xa60   : > { %p25_p5 = scmp.ge.s32.totalorder %s28_s23, 4   ;;  %s2931_s22 = sld [smem:[#allocation10_spill]] }
 0xa61   : > { %s2932_s18 = smov %s2370_s19  ;;  %s2933_s19 = smov %s2374_s20 }
 0xa62   : > { %s2934_s20 = smov %s2534_s16  ;;  %27 = sbr.rel (!%p25_p5) target bundleno = 9 (0x9), region = 129 }
 0xa69   :  { %1929 = vsyncpa [#allocation7], 1 }
 0xa6a   :  { %1931 = vsyncpa [#allocation7 + $0x1], 1 }

</bundles_post_ra>
